<compile_context>
chip_gen: v7x
topology: tpu7x:2x2x1
jax: 0.10.0
libtpu: 0.0.40
codegen_flags: <defaults>
</compile_context>

<pallas_src>
import jax
import jax.numpy as jnp
from jax.experimental import pallas as pl
from jax.experimental.pallas import tpu as pltpu

N_EMBED = 256
FF_HIDDEN = 4 * N_EMBED      # 1024
TM = 64                      # rows per grid step


def ffwd_kernel(x_ref, w1_ref, b1_ref, w2_ref, b2_ref, o_ref):
    x = x_ref[...]                                           # (TM, C) f32
    # Linear 1: bf16 operands, f32 accumulation on the MXU.
    h = jnp.dot(x.astype(jnp.bfloat16), w1_ref[...],
                preferred_element_type=jnp.float32)
    h = h + b1_ref[...]                                      # f32 bias add
    h = jnp.maximum(h, 0.0)                                  # ReLU (VPU)
    # Linear 2: bf16 operands, f32 accumulation on the MXU.
    y = jnp.dot(h.astype(jnp.bfloat16), w2_ref[...],
                preferred_element_type=jnp.float32)
    o_ref[...] = (y + b2_ref[...]).astype(o_ref.dtype)
    # Dropout(0.25) is identity in eval mode.


def feedforward(x, params):
    """x: (B, T, C) f32. params: (W1 bf16, b1 f32, W2 bf16, b2 f32)."""
    w1, b1, w2, b2 = params
    B, T, C = x.shape
    assert C == N_EMBED
    rows = B * T
    assert rows % TM == 0, "B*T must be divisible by the row tile"
    x2d = x.reshape(rows, C)

    grid = (rows // TM,)
    in_specs = [
        pl.BlockSpec((TM, C), lambda i: (i, 0)),            # x rows
        pl.BlockSpec((C, FF_HIDDEN), lambda i: (0, 0)),     # W1 (resident)
        pl.BlockSpec((1, FF_HIDDEN), lambda i: (0, 0)),     # b1
        pl.BlockSpec((FF_HIDDEN, C), lambda i: (0, 0)),     # W2 (resident)
        pl.BlockSpec((1, C), lambda i: (0, 0)),             # b2
    ]
    out2d = pl.pallas_call(
        ffwd_kernel,
        out_shape=jax.ShapeDtypeStruct((rows, C), jnp.float32),
        grid=grid,
        in_specs=in_specs,
        out_specs=pl.BlockSpec((TM, C), lambda i: (i, 0)),
        compiler_params=pltpu.CompilerParams(
            dimension_semantics=("parallel",)),
    )(x2d, w1, b1, w2, b2)
    return out2d.reshape(B, T, C)


def init_params(key):
    k1, k2 = jax.random.split(key)
    s = 0.02
    w1 = (s * jax.random.normal(k1, (N_EMBED, FF_HIDDEN), jnp.float32)
          ).astype(jnp.bfloat16)
    b1 = jnp.zeros((1, FF_HIDDEN), jnp.float32)
    w2 = (s * jax.random.normal(k2, (FF_HIDDEN, N_EMBED), jnp.float32)
          ).astype(jnp.bfloat16)
    b2 = jnp.zeros((1, N_EMBED), jnp.float32)
    return (w1, b1, w2, b2)


def feedforward_ref(x, params):
    """Pure-JAX reference (matches PyTorch FeedForward.forward in eval mode)."""
    w1, b1, w2, b2 = params
    h = x @ w1.astype(jnp.float32) + b1
    h = jnp.maximum(h, 0.0)
    return h @ w2.astype(jnp.float32) + b2


if __name__ == "__main__":
    key = jax.random.PRNGKey(0)
    kx, kp = jax.random.split(key)
    B, T = 2, 128                                   # B*T = 256 rows, C = 256
    x = jax.random.normal(kx, (B, T, N_EMBED), jnp.float32)
    params = init_params(kp)

    out = feedforward(x, params)
    out = jax.block_until_ready(out)

    ref = feedforward_ref(x, params)
    assert out.shape == (B, T, N_EMBED)
    assert jnp.allclose(out, ref, rtol=1e-2, atol=1e-2), "mismatch vs reference"
    print("KERNEL_OK")
</pallas_src>

<mosaic_0001>
module attributes {stable_mosaic.version = 11 : i64} {
  func.func @ffwd_kernel(%arg0: i32, %arg1: memref<64x256xf32, #tpu.memory_space<vmem>>, %arg2: memref<256x1024xbf16, #tpu.memory_space<vmem>>, %arg3: memref<1x1024xf32, #tpu.memory_space<vmem>>, %arg4: memref<1024x256xbf16, #tpu.memory_space<vmem>>, %arg5: memref<1x256xf32, #tpu.memory_space<vmem>>, %arg6: memref<64x256xf32, #tpu.memory_space<vmem>>) attributes {dimension_semantics = [#tpu.dimension_semantics<parallel>], iteration_bounds = array<i64: 4>, scalar_prefetch = 0 : i64, scratch_operands = 0 : i64, tpu.core_type = #tpu.core_type<tc>, window_params = [{transform_indices = @transform_0, window_bounds = array<i64: 64, 256>}, {pipeline_mode = #tpu.pipeline_mode<synchronous>, transform_indices = @transform_1, window_bounds = array<i64: 256, 1024>}, {pipeline_mode = #tpu.pipeline_mode<synchronous>, transform_indices = @transform_2, window_bounds = array<i64: 1, 1024>}, {pipeline_mode = #tpu.pipeline_mode<synchronous>, transform_indices = @transform_3, window_bounds = array<i64: 1024, 256>}, {pipeline_mode = #tpu.pipeline_mode<synchronous>, transform_indices = @transform_4, window_bounds = array<i64: 1, 256>}, {transform_indices = @transform_5, window_bounds = array<i64: 64, 256>}]} {
    %c0 = arith.constant 0 : index
    %c0_0 = arith.constant 0 : index
    %0 = vector.load %arg1[%c0, %c0_0] : memref<64x256xf32, #tpu.memory_space<vmem>>, vector<64x256xf32>
    %1 = arith.truncf %0 : vector<64x256xf32> to vector<64x256xbf16>
    %c0_1 = arith.constant 0 : index
    %c0_2 = arith.constant 0 : index
    %2 = vector.load %arg2[%c0_1, %c0_2] : memref<256x1024xbf16, #tpu.memory_space<vmem>>, vector<256x1024xbf16>
    %cst = arith.constant dense<0.000000e+00> : vector<64x1024xf32>
    %3 = tpu.matmul %1, %2, %cst {dimension_numbers = #tpu.dot_dimension_numbers<[1], [0], [0], [1], [0, 0, 1, 1], [], []>} : vector<64x256xbf16>, vector<256x1024xbf16>, vector<64x1024xf32> -> vector<64x1024xf32>
    %c0_3 = arith.constant 0 : index
    %c0_4 = arith.constant 0 : index
    %4 = vector.load %arg3[%c0_3, %c0_4] : memref<1x1024xf32, #tpu.memory_space<vmem>>, vector<1x1024xf32>
    %5 = vector.broadcast %4 : vector<1x1024xf32> to vector<64x1024xf32>
    %6 = arith.addf %3, %5 : vector<64x1024xf32>
    %cst_5 = arith.constant 0.000000e+00 : f32
    %7 = vector.broadcast %cst_5 : f32 to vector<64x1024xf32>
    %8 = arith.maximumf %6, %7 : vector<64x1024xf32>
    %9 = arith.truncf %8 : vector<64x1024xf32> to vector<64x1024xbf16>
    %c0_6 = arith.constant 0 : index
    %c0_7 = arith.constant 0 : index
    %10 = vector.load %arg4[%c0_6, %c0_7] : memref<1024x256xbf16, #tpu.memory_space<vmem>>, vector<1024x256xbf16>
    %cst_8 = arith.constant dense<0.000000e+00> : vector<64x256xf32>
    %11 = tpu.matmul %9, %10, %cst_8 {dimension_numbers = #tpu.dot_dimension_numbers<[1], [0], [0], [1], [0, 0, 1, 1], [], []>} : vector<64x1024xbf16>, vector<1024x256xbf16>, vector<64x256xf32> -> vector<64x256xf32>
    %c0_9 = arith.constant 0 : index
    %c0_10 = arith.constant 0 : index
    %12 = vector.load %arg5[%c0_9, %c0_10] : memref<1x256xf32, #tpu.memory_space<vmem>>, vector<1x256xf32>
    %13 = vector.broadcast %12 : vector<1x256xf32> to vector<64x256xf32>
    %14 = arith.addf %11, %13 : vector<64x256xf32>
    %c0_11 = arith.constant 0 : index
    %c0_12 = arith.constant 0 : index
    %15 = vector.load %arg6[%c0_11, %c0_12] : memref<64x256xf32, #tpu.memory_space<vmem>>, vector<64x256xf32>
    tpu.vector_store %arg6[%c0_11, %c0_12], %14 {strides = array<i32>} : memref<64x256xf32, #tpu.memory_space<vmem>>, vector<64x256xf32>,
    return
  }
  func.func @transform_0(%arg0: i32) -> (i32, i32) {
    %c0_i32 = arith.constant 0 : i32
    %c0_i32_0 = arith.constant 0 : i32
    return %arg0, %c0_i32 : i32, i32
  }
  func.func @transform_1(%arg0: i32) -> (i32, i32) {
    %c0_i32 = arith.constant 0 : i32
    %c0_i32_0 = arith.constant 0 : i32
    %c0_i32_1 = arith.constant 0 : i32
    return %c0_i32, %c0_i32_0 : i32, i32
  }
  func.func @transform_2(%arg0: i32) -> (i32, i32) {
    %c0_i32 = arith.constant 0 : i32
    %c0_i32_0 = arith.constant 0 : i32
    %c0_i32_1 = arith.constant 0 : i32
    return %c0_i32, %c0_i32_0 : i32, i32
  }
  func.func @transform_3(%arg0: i32) -> (i32, i32) {
    %c0_i32 = arith.constant 0 : i32
    %c0_i32_0 = arith.constant 0 : i32
    %c0_i32_1 = arith.constant 0 : i32
    return %c0_i32, %c0_i32_0 : i32, i32
  }
  func.func @transform_4(%arg0: i32) -> (i32, i32) {
    %c0_i32 = arith.constant 0 : i32
    %c0_i32_0 = arith.constant 0 : i32
    %c0_i32_1 = arith.constant 0 : i32
    return %c0_i32, %c0_i32_0 : i32, i32
  }
  func.func @transform_5(%arg0: i32) -> (i32, i32) {
    %c0_i32 = arith.constant 0 : i32
    %c0_i32_0 = arith.constant 0 : i32
    return %arg0, %c0_i32 : i32, i32
  }
}

</mosaic_0001>

<bundles_post_ra>
// kernel: tpu_custom_call.1
= control target key start
LH: loop header
LB: loop body
LE: loop exit
PB: predicated region body
PF: predicated region fallthrough
CT: control target
= control target key end

     0   :  { %10 = vsyncpa [#allocation3], 0  ;;  %s4028_s0 = inlined_call_operand.hbm [shape: f32[256,256], index: 0, kind: input, shape index: {}]   ;;  %s4029_s1 = inlined_call_operand.hbm [shape: bf16[256,1024], index: 1, kind: input, shape index: {}]   ;;  %s4030_s2 = inlined_call_operand.hbm [shape: f32[1,1024], index: 2, kind: input, shape index: {}]   ;;  %s4031_s3 = inlined_call_operand.hbm [shape: bf16[1024,256], index: 3, kind: input, shape index: {}]   ;;  %s4032_s4 = inlined_call_operand.vmem [shape: f32[1,256], index: 4, kind: input, shape index: {}]   ;;  %s4033_s5 = inlined_call_operand.hbm [shape: f32[256,256], index: 5, kind: output, shape index: {}]  }
   0x1   :  { %12 = vsyncpa [#allocation3 + $0x1], 0 }
   0x2   :  { %13 = vsyncpa [#allocation6], 0 }
   0x3   :  { %14 = vsyncpa [#allocation9], 0 }
   0x4   :  { %15 = vsyncpa [#allocation4], 0 }
   0x5   :  { %17 = vsyncpa [#allocation4 + $0x1], 0  ;;  %s3571_s18 = smov 0   ;;  %s3573_s19 = smov 0  }
   0x6   :  { %s3575_s20 = smov 0   ;;  %s3577_s21 = smov 0  }
   0x7 LB: > { %s3592_s22 = sadd.s32 4294967295, %s3526_s21   ;;  %s2715_s23 = sadd.s32 4294967294, %s3526_s21   ;;  %s3526_s21 = sphi %s3577_s21, %s4055_s21   ;;  %s3522_s20 = sphi %s3575_s20, %s4054_s20   ;;  %s3518_s19 = sphi %s3573_s19, %s4053_s19   ;;  %s3514_s18 = sphi %s3571_s18, %s4052_s18  }
   0x8   : > { %p43_p0 = scmp.ne.s32.totalorder %s3518_s19, %s3514_s18  ;;  %p4034_p1 = scmp.eq.s32.totalorder %s3592_s22, 0 }
   0x9   : > { %p157_p3 = scmp.eq.s32.totalorder %s2715_s23, 3  ;;  %p2716_p5 = scmp.ge.s32.totalorder %s3526_s21, 1 }
   0xa   : > { %p3601_p4 = por %p4034_p1, %p43_p0  ;;  %p164_p7 = scmp.lt.s32.totalorder %s3526_s21, 5 }
   0xb   : > { %p3606_p6 = por %p157_p3, %p43_p0  ;;  %s3528_s27 = smov [#allocation5]  }
   0xc   : > { %s4037_s24 = scalar_select %p3601_p4, 1, 0 }
   0xd   : > { %s4038_s25 = scalar_select %p3606_p6, 1, 0 }
   0xe   : > { %p3611_p8 = pnand %p2716_p5, %p164_p7  ;;  %s176_s28 = sshll.u32 %s3528_s27, 4  ;;  %s3615_s28 = int_to_ptr.vmem [resolvable:$true] %s176_s28 }
   0xf   : > { %s3529_s30 = smov [#allocation7]   ;;  %s3530_s7 = smov [#allocation8]  }
  0x10   : > { %s4039_s26 = scalar_select %p3611_p8, 1, 0 }
  0x11   : > { %p3077_p9 = pneg %p3611_p8  ;;  %s190_s6 = sshll.u32 %s3529_s30, 4  ;;  %s3625_s6 = int_to_ptr.vmem [resolvable:$true] %s190_s6 }
  0x12   : > { %s3627_s8 = sshll.u32 %s3530_s7, 4  ;;  %s3338_s11 = scalar_lea.hbm %s4029_s1, 16384  ;;  %s201_s8 = int_to_ptr.vmem [resolvable:$true] %s3627_s8 }
  0x13   : > { %p3621_p10 = pnand %p3077_p9, %p4034_p1  ;;  %p3339_p11 = scmp.ne.s32.totalorder %s4029_s1, %s3338_s11 }
  0x14   : > { %p3345_p3 = scmp.lt.u32.totalorder %s3338_s11, %s4029_s1 }
  0x15   : > { %p3637_p12 = pneg %p3621_p10 }
  0x17   : > { %p3341_p13 = pnand %p3637_p12, %p3339_p11 }
  0x19   : > { %p3342_p0 = pneg %p3341_p13 }
  0x1b   : > { %p3347_p5 = pnand %p3345_p3, %p3342_p0 }
  0x1d   : > { %3350 = shalt.err (!%p3347_p5)
}
  0x1e   : > { %s3351_s17 = scalar_lea.vmem %s3615_s28, 16384  ;;  %p3359_p2 = scmp.lt.s32.totalorder %s3615_s28, %s3615_s28 }
  0x1f   : > { %p3352_p7 = scmp.ne.s32.totalorder %s3615_s28, %s3351_s17  ;;  %p3360_p6 = scmp.lt.s32.totalorder %s3351_s17, %s3351_s17 }
  0x21   : > { %p3354_p9 = pnand %p3352_p7, %p3637_p12  ;;  %p3361_p11 = por %p3360_p6, %p3359_p2 }
  0x23   : > { %p3355_p1 = pneg %p3354_p9 }
  0x25   : > { %p3362_p13 = pnand %p3361_p11, %p3355_p1 }
  0x27   : > { %3365 = shalt.err (!%p3362_p13)
}
  0x28   : > { %s3531_s23 = smov 512   ;;  %s3532_s27 = smov 32  }
  0x29   : > { %3080 = dma.hbm_to_vmem [thread:$0]  (!%p3621_p10), %s4029_s1, 16384, %s3615_s28, [#allocation6], %s3531_s23, %s3531_s23, %s3532_s27  }
  0x2a   : > { %s3366_s11 = scalar_lea.hbm %s4030_s2, 128 }
  0x2b   : > { %p3367_p2 = scmp.ne.s32.totalorder %s4030_s2, %s3366_s11  ;;  %p3373_p0 = scmp.lt.u32.totalorder %s3366_s11, %s4030_s2 }
  0x2d   : > { %p3369_p1 = pnand %p3367_p2, %p3637_p12 }
  0x2f   : > { %p3370_p6 = pneg %p3369_p1 }
  0x31   : > { %p3375_p3 = pnand %p3373_p0, %p3370_p6 }
  0x33   : > { %3378 = shalt.err (!%p3375_p3)
}
  0x34   : > { %s3379_s28 = scalar_lea.vmem %s3625_s6, 128  ;;  %p3387_p11 = scmp.lt.s32.totalorder %s3625_s6, %s3625_s6 }
  0x35   : > { %p3380_p5 = scmp.ne.s32.totalorder %s3625_s6, %s3379_s28  ;;  %p3388_p13 = scmp.lt.s32.totalorder %s3379_s28, %s3379_s28 }
  0x37   : > { %p3382_p7 = pnand %p3380_p5, %p3637_p12  ;;  %p3389_p2 = por %p3388_p13, %p3387_p11 }
  0x39   : > { %p3383_p9 = pneg %p3382_p7 }
  0x3b   : > { %p3390_p1 = pnand %p3389_p2, %p3383_p9 }
  0x3d   : > { %3393 = shalt.err (!%p3390_p1)
}
  0x3e   : > { %3083 = dma.hbm_to_vmem [thread:$0]  (!%p3621_p10), %s4030_s2, 128, %s3625_s6, [#allocation6]  }
  0x3f   : > { %s3394_s7 = scalar_lea.hbm %s4031_s3, 16384 }
  0x40   : > { %p3395_p6 = scmp.ne.s32.totalorder %s4031_s3, %s3394_s7  ;;  %p3401_p5 = scmp.lt.u32.totalorder %s3394_s7, %s4031_s3 }
  0x42   : > { %p3397_p0 = pnand %p3395_p6, %p3637_p12 }
  0x44   : > { %p3398_p3 = pneg %p3397_p0 }
  0x46   : > { %p3403_p7 = pnand %p3401_p5, %p3398_p3 }
  0x48   : > { %3406 = shalt.err (!%p3403_p7)
}
  0x49   : > { %s3407_s13 = scalar_lea.vmem %s201_s8, 16384  ;;  %p3415_p2 = scmp.lt.s32.totalorder %s201_s8, %s201_s8 }
  0x4a   : > { %p3408_p9 = scmp.ne.s32.totalorder %s201_s8, %s3407_s13  ;;  %p3416_p1 = scmp.lt.s32.totalorder %s3407_s13, %s3407_s13 }
  0x4c   : > { %p3410_p11 = pnand %p3408_p9, %p3637_p12  ;;  %p3417_p4 = por %p3416_p1, %p3415_p2 }
  0x4e   : > { %p3411_p13 = pneg %p3410_p11 }
  0x50   : > { %p3418_p8 = pnand %p3417_p4, %p3411_p13 }
  0x52   : > { %3421 = shalt.err (!%p3418_p8)
}
  0x53   : > { %s3533_s6 = smov 128   ;;  %s3534_s14 = smov 8  }
  0x54   : > { %3086 = dma.hbm_to_vmem [thread:$0]  (!%p3621_p10), %s4031_s3, 16384, %s201_s8, [#allocation9], %s3533_s6, %s3533_s6, %s3534_s14  }
  0x55   : > { %s3701_s28 = sadd.s32 1, %s3526_s21   ;;  %s30_s23 = sadd.s32 1, %s3522_s20 }
  0x56   : > { %s27_s17 = ssub.s32 %s3526_s21, %s3701_s28  ;;  %p37_p8 = scmp.ne.s32.totalorder %s3522_s20, %s3518_s19 }
  0x57   : > { %p28_p4 = scmp.eq.s32.totalorder %s27_s17, 0  ;;  %p38_p12 = scmp.eq.s32.totalorder %s3526_s21, 0 }
  0x58   : > { %p3098_p6 = scmp.lt.s32.totalorder %s3526_s21, 4  ;;  %p4042_p3 = scmp.eq.s32.totalorder %s3592_s22, 3 }
  0x59   : > { %s3711_s27 = scalar_select %p28_p4, %s3522_s20, %s30_s23  }
  0x5a   : > { %p39_p0 = por %p38_p12, %p37_p8  ;;  %p3715_p5 = por %p4042_p3, %p37_p8 }
  0x5b   : > { %s217_s29 = sand.u32 1, %s3522_s20   ;;  %s2994_s7 = sshll.u32 %s3526_s21, 11 }
  0x5c   : > { %s2721_s8 = sshll.u32 %s217_s29, 7  ;;  %s3724_s11 = scalar_lea.hbm %s4028_s0, %s2994_s7 }
  0x5d   : > { %s221_s12 = scalar_lea.vmem [#allocation2], %s2721_s8  ;;  %p3726_p10 = pnand %p3098_p6, %p39_p0 }
  0x5e   : > { %s229_s13 = sshll.u32 %s221_s12, 4  ;;  %s3732_s14 = scalar_lea.sflag [#allocation3], %s217_s29  ;;  %s3730_s13 = int_to_ptr.vmem [resolvable:$true] %s229_s13 }
  0x5f   : > { %s3422_s15 = scalar_lea.hbm %s3724_s11, 2048  ;;  %p3424_p9 = pneg %p3726_p10 }
  0x60   : > { %p3423_p7 = scmp.ne.s32.totalorder %s3724_s11, %s3422_s15  ;;  %s3427_s23 = scalar_lea.hbm %s4028_s0, 8192 }
  0x61   : > { %p3428_p2 = scmp.lt.u32.totalorder %s3724_s11, %s4028_s0  ;;  %p3429_p1 = scmp.lt.u32.totalorder %s3427_s23, %s3422_s15 }
  0x62   : > { %p3425_p11 = pnand %p3424_p9, %p3423_p7  ;;  %p3431_p8 = scmp.lt.u32.totalorder %s3422_s15, %s3724_s11 }
  0x63   : > { %p3430_p4 = por %p3429_p1, %p3428_p2 }
  0x64   : > { %p3426_p13 = pneg %p3425_p11 }
  0x65   : > { %p3432_p12 = por %p3431_p8, %p3430_p4 }
  0x67   : > { %p3433_p6 = pnand %p3432_p12, %p3426_p13 }
  0x69   : > { %3436 = shalt.err (!%p3433_p6)
}
  0x6a   : > { %s3437_s29 = scalar_lea.vmem %s3730_s13, 2048  ;;  %s3535_s9 = smov [#allocation2]  }
  0x6b   : > { %p3438_p0 = scmp.ne.s32.totalorder %s3730_s13, %s3437_s29  ;;  %s3442_s10 = sshll.u32 %s3535_s9, 4  ;;  %s3443_s10 = int_to_ptr.vmem [resolvable:$false] %s3442_s10 }
  0x6c   : > { %s3444_s12 = scalar_lea.vmem %s3443_s10, 4096  ;;  %p3445_p11 = scmp.lt.s32.totalorder %s3730_s13, %s3443_s10 }
  0x6d   : > { %p3440_p3 = pnand %p3438_p0, %p3424_p9  ;;  %p3446_p2 = scmp.lt.s32.totalorder %s3444_s12, %s3437_s29 }
  0x6f   : > { %p3441_p7 = pneg %p3440_p3  ;;  %p3447_p1 = por %p3446_p2, %p3445_p11 }
  0x71   : > { %p3448_p4 = pnand %p3447_p1, %p3441_p7 }
  0x73   : > { %3451 = shalt.err (!%p3448_p4)
}
  0x74   : > { %s3536_s15 = smov 256   ;;  %s3537_s16 = smov 16  }
  0x75   : > { %3090 = dma.hbm_to_vmem [thread:$0]  (!%p3726_p10), %s3724_s11, 2048, %s3730_s13, %s3732_s14, %s3536_s15, %s3536_s15, %s3537_s16  }
  0x76   : > { %p4045_p9 = scmp.ne.s32.totalorder %s4039_s26, 0 }
  0x77   : > { %s3763_s17 = sand.u32 (!%p4045_p9), 1, %s3518_s19   ;;  %p4046_p13 = scmp.ne.s32.totalorder (!%p4045_p9), %s4037_s24, 0 }
  0x78   : > { %241 = sbr.rel (%p4045_p9) target bundleno = 873 (0x369), region = 40  ;;  %s2726_s23 = sshll.u32 (!%p4045_p9), %s3763_s17, 7 }
  0x79   : > { %s244_s7 = scalar_lea.sflag (!%p4045_p9), [#allocation3], %s3763_s17  ;;  %s3769_s8 = scalar_lea.vmem (!%p4045_p9), [#allocation2], %s2726_s23 }
  0x7f   : > { %3497 = dma.done.wait (%p4046_p13), %s244_s7, 2048  }
  0x80   : > { %3499 = vsyncadd (%p4046_p13), %s244_s7, 4294965248  ;;  %p4047_p10 = scmp.eq.s32.totalorder %s3592_s22, 0 }
  0x82   : > { %3501 = dma.done.wait (%p4047_p10), [#allocation6], 16512   ;;  %p4048_p8 = pmov %p4047_p10 }
  0x84   : > { %3503 = vsyncadd (%p4048_p8), [#allocation6], 4294950784  ;;  %p4049_p12 = pmov %p4048_p8 }
  0x85   : > { %p4050_p6 = pmov %p4048_p8 }
  0x86   : > { %3505 = dma.done.wait (%p4049_p12), [#allocation9], 16384  }
  0x87   : > { %3507 = vsyncadd (%p4050_p6), [#allocation9], 4294950912  ;;  %v312_v0 = vld [vmem:[#allocation5] sm:$0xff]  ;;  %v289_v17 = vld [vmem:[%s3769_s8 + $0x8] sm:$0xff]  ;;  %s3960_s11 = scalar_lea.vmem [#allocation10], %s2726_s23  ;;  %s2996_s13 = sshll.u32 %s3592_s22, 11 }
  0x88   : > { %v316_v1 = vld [vmem:[#allocation5 + $0x20] sm:$0xff]  ;;  %v291_v18 = vld [vmem:[%s3769_s8 + $0x18] sm:$0xff]  ;;  %s2613_s6 = sshll.u32 %s3960_s11, 4  ;;  %s3980_s9 = scalar_lea.hbm %s4033_s5, %s2996_s13  ;;  %s3982_s6 = int_to_ptr.vmem [resolvable:$true] %s2613_s6 }
  0x89   : > { %v320_v2 = vld [vmem:[#allocation5 + $0x40] sm:$0xff]  ;;  %v2732_v3 = vcombine.high %v312_v0, %v316_v1  ;;  %v2731_v4 = vcombine.low %v312_v0, %v316_v1  ;;  %v3785_v20 = vpack.c.bf16 %v291_v18, %v289_v17  ;;  %v313_v1 = vld [vmem:[#allocation5 + $0x8] sm:$0xff]  ;;  %s2599_s22 = scalar_lea.sflag [#allocation4], %s3763_s17  ;;  %s3452_s10 = scalar_lea.vmem %s3982_s6, 2048 }
  0x8a   : > { %v324_v5 = vld [vmem:[#allocation5 + $0x60] sm:$0xff]  ;;  %p3453_p0 = scmp.ne.s32.totalorder %s3982_s6, %s3452_s10  ;;  %s3538_s12 = smov [#allocation10]  }
  0x8b   : > { %v2740_v6 = vcombine.high %v320_v2, %v324_v5  ;;  %v328_v7 = vld [vmem:[#allocation5 + $0x80] sm:$0xff]  ;;  %1122 = vmatprep.subr.bf16.mxu1 %v2732_v3  ;;  %v2739_v9 = vcombine.low %v320_v2, %v324_v5  ;;  %1154 = vmatprep.mubr.bf16.mxu1 %v3785_v20  ;;  %v317_v2 = vld [vmem:[#allocation5 + $0x28] sm:$0xff]  ;;  %v290_v5 = vld [vmem:[%s3769_s8 + $0x10] sm:$0xff]  ;;  %s3456_s15 = sshll.u32 %s3538_s12, 4  ;;  %s3457_s15 = int_to_ptr.vmem [resolvable:$false] %s3456_s15 }
  0x8c   : > { %v332_v8 = vld [vmem:[#allocation5 + $0xa0] sm:$0xff]  ;;  %1123 = vmatpush1.bf16.msra.mxu1 %v2731_v4  ;;  %p3454_p3 = pnand %p3453_p0, %p3715_p5  ;;  %s3458_s16 = scalar_lea.vmem %s3457_s15, 4096 }
  0x8d   : > { %1124 = vmatprep.subr.bf16.mxu1 %v2740_v6  ;;  %v2748_v10 = vcombine.high %v328_v7, %v332_v8  ;;  %v336_v11 = vld [vmem:[#allocation5 + $0xc0] sm:$0xff]  ;;  %v2747_v13 = vcombine.low %v328_v7, %v332_v8  ;;  %v321_v7 = vld [vmem:[#allocation5 + $0x48] sm:$0xff]  ;;  %p3459_p11 = scmp.lt.s32.totalorder %s3982_s6, %s3457_s15  ;;  %p3460_p2 = scmp.lt.s32.totalorder %s3458_s16, %s3452_s10 }
  0x8e   : > { %v340_v12 = vld [vmem:[#allocation5 + $0xe0] sm:$0xff]  ;;  %v325_v8 = vld [vmem:[#allocation5 + $0x68] sm:$0xff]  ;;  %p3455_p7 = pneg %p3454_p3 }
  0x8f   : > { %v2756_v14 = vcombine.high %v336_v11, %v340_v12  ;;  %v344_v15 = vld [vmem:[#allocation5 + $0x100] sm:$0xff]  ;;  %v2755_v19 = vcombine.low %v336_v11, %v340_v12  ;;  %v2734_v11 = vcombine.high %v313_v1, %v317_v2  ;;  %v2742_v17 = vcombine.high %v321_v7, %v325_v8  ;;  %p3461_p1 = por %p3460_p2, %p3459_p11 }
  0x90   : > { %1125 = vmatpush1.bf16.msra.mxu1 %v2739_v9  ;;  %v348_v16 = vld [vmem:[#allocation5 + $0x120] sm:$0xff]  ;;  %v293_v9 = vld [vmem:[%s3769_s8 + $0x28] sm:$0xff] }
  0x91   : > { %1126 = vmatprep.subr.bf16.mxu1 %v2748_v10  ;;  %v2764_v21 = vcombine.high %v344_v15, %v348_v16  ;;  %v352_v22 = vld [vmem:[#allocation5 + $0x140] sm:$0xff]  ;;  %v2763_v24 = vcombine.low %v344_v15, %v348_v16  ;;  %v295_v10 = vld [vmem:[%s3769_s8 + $0x38] sm:$0xff]  ;;  %v333_v15 = vld [vmem:[#allocation5 + $0xa8] sm:$0xff]  ;;  %p3462_p4 = pnand %p3461_p1, %p3455_p7 }
  0x92   : > { %v356_v23 = vld [vmem:[#allocation5 + $0x160] sm:$0xff]  ;;  %v3794_v16 = vpack.c.bf16 %v295_v10, %v293_v9  ;;  %v405_v9 = vld [vmem:[#allocation5 + $0x2e8] sm:$0xff] }
  0x93   : > { %v2772_v25 = vcombine.high %v352_v22, %v356_v23  ;;  %v360_v26 = vld [vmem:[#allocation5 + $0x180] sm:$0xff]  ;;  %v2771_v28 = vcombine.low %v352_v22, %v356_v23  ;;  %v337_v22 = vld [vmem:[#allocation5 + $0xc8] sm:$0xff] }
  0x94   : > { %1127 = vmatpush1.bf16.msra.mxu1 %v2747_v13  ;;  %v364_v27 = vld [vmem:[#allocation5 + $0x1a0] sm:$0xff]  ;;  %v2733_v13 = vcombine.low %v313_v1, %v317_v2  ;;  %v341_v23 = vld [vmem:[#allocation5 + $0xe8] sm:$0xff] }
  0x95   : > { %1128 = vmatprep.subr.bf16.mxu1 %v2756_v14  ;;  %v2780_v29 = vcombine.high %v360_v26, %v364_v27  ;;  %v368_v30 = vld [vmem:[#allocation5 + $0x1c0] sm:$0xff]  ;;  %v2779_v32 = vcombine.low %v360_v26, %v364_v27  ;;  %v329_v14 = vld [vmem:[#allocation5 + $0x88] sm:$0xff] }
  0x96   : > { %v372_v31 = vld [vmem:[#allocation5 + $0x1e0] sm:$0xff]  ;;  %v2750_v26 = vcombine.high %v329_v14, %v333_v15  ;;  %v393_v2 = vld [vmem:[#allocation5 + $0x288] sm:$0xff] }
  0x97   : > { %v2788_v33 = vcombine.high %v368_v30, %v372_v31  ;;  %v376_v34 = vld [vmem:[#allocation5 + $0x200] sm:$0xff]  ;;  %v2787_v36 = vcombine.low %v368_v30, %v372_v31  ;;  %v349_v30 = vld [vmem:[#allocation5 + $0x128] sm:$0xff] }
  0x98   : > { %1129 = vmatpush1.bf16.msra.mxu1 %v2755_v19  ;;  %v380_v35 = vld [vmem:[#allocation5 + $0x220] sm:$0xff]  ;;  %v294_v19 = vld [vmem:[%s3769_s8 + $0x30] sm:$0xff] }
  0x99   : > { %1130 = vmatprep.subr.bf16.mxu1 %v2764_v21  ;;  %v2796_v37 = vcombine.high %v376_v34, %v380_v35  ;;  %v384_v38 = vld [vmem:[#allocation5 + $0x240] sm:$0xff]  ;;  %v2795_v40 = vcombine.low %v376_v34, %v380_v35  ;;  %v2741_v21 = vcombine.low %v321_v7, %v325_v8  ;;  %v298_v34 = vld [vmem:[%s3769_s8 + $0x50] sm:$0xff]  ;;  %v2757_v35 = vcombine.low %v337_v22, %v341_v23  ;;  %v401_v8 = vld [vmem:[#allocation5 + $0x2c8] sm:$0xff] }
  0x9a   : > { %v388_v39 = vld [vmem:[#allocation5 + $0x260] sm:$0xff]  ;;  %v3152_v10 = vld [vmem:[#allocation8 + $0x24] ss:$8 sps:$4 sm:$0xff]  }
  0x9b   : > { %v392_v41 = vld [vmem:[#allocation5 + $0x280] sm:$0xff]  ;;  %v2804_v43 = vcombine.high %v384_v38, %v388_v39  ;;  %v2803_v44 = vcombine.low %v384_v38, %v388_v39  ;;  %v301_v38 = vld [vmem:[%s3769_s8 + $0x68] sm:$0xff]  ;;  %v303_v39 = vld [vmem:[%s3769_s8 + $0x78] sm:$0xff] }
  0x9c   : > { %1131 = vmatpush1.bf16.msra.mxu1 %v2763_v24  ;;  %v396_v42 = vld [vmem:[#allocation5 + $0x2a0] sm:$0xff]  ;;  %v297_v24 = vld [vmem:[%s3769_s8 + $0x48] sm:$0xff] }
  0x9d   : > { %1132 = vmatprep.subr.bf16.mxu1 %v2772_v25  ;;  %v400_v45 = vld [vmem:[#allocation5 + $0x2c0] sm:$0xff]  ;;  %v2812_v47 = vcombine.high %v392_v41, %v396_v42  ;;  %v2811_v48 = vcombine.low %v392_v41, %v396_v42  ;;  %v299_v25 = vld [vmem:[%s3769_s8 + $0x58] sm:$0xff] }
  0x9e   : > { %v404_v46 = vld [vmem:[#allocation5 + $0x2e0] sm:$0xff]  ;;  %v3804_v31 = vpack.c.bf16 %v299_v25, %v297_v24  ;;  %v421_v24 = vld [vmem:[#allocation5 + $0x368] sm:$0xff] }
  0x9f   : > { %v408_v49 = vld [vmem:[#allocation5 + $0x300] sm:$0xff]  ;;  %v2820_v51 = vcombine.high %v400_v45, %v404_v46  ;;  %v2819_v52 = vcombine.low %v400_v45, %v404_v46  ;;  %v3814_v45 = vpack.c.bf16 %v303_v39, %v301_v38  ;;  %v3158_v25 = vld [vmem:[#allocation8 + $0x44] ss:$8 sps:$4 sm:$0xff]  }
  0xa0   : > { %1133 = vmatpush1.bf16.msra.mxu1 %v2771_v28  ;;  %v412_v50 = vld [vmem:[#allocation5 + $0x320] sm:$0xff]  ;;  %v2749_v28 = vcombine.low %v329_v14, %v333_v15  ;;  %v2822_v14 = vcombine.high %v401_v8, %v405_v9  ;;  %v409_v15 = vld [vmem:[#allocation5 + $0x308] sm:$0xff] }
  0xa1   : > { %1134 = vmatprep.subr.bf16.mxu1 %v2780_v29  ;;  %v416_v53 = vld [vmem:[#allocation5 + $0x340] sm:$0xff]  ;;  %v2828_v55 = vcombine.high %v408_v49, %v412_v50  ;;  %v2827_v56 = vcombine.low %v408_v49, %v412_v50  ;;  %v345_v29 = vld [vmem:[#allocation5 + $0x108] sm:$0xff]  ;;  %v302_v49 = vld [vmem:[%s3769_s8 + $0x70] sm:$0xff] }
  0xa2   : > { %v420_v54 = vld [vmem:[#allocation5 + $0x360] sm:$0xff]  ;;  %v2765_v42 = vcombine.low %v345_v29, %v349_v30  ;;  %v437_v38 = vld [vmem:[#allocation5 + $0x3e8] sm:$0xff] }
  0xa3   : > { %v424_v57 = vld [vmem:[#allocation5 + $0x380] sm:$0xff]  ;;  %v2836_v59 = vcombine.high %v416_v53, %v420_v54  ;;  %v2835_v60 = vcombine.low %v416_v53, %v420_v54  ;;  %v3164_v39 = vld [vmem:[#allocation8 + $0x64] ss:$8 sps:$4 sm:$0xff]  }
  0xa4   : > { %1135 = vmatpush1.bf16.msra.mxu1 %v2779_v32  ;;  %v428_v58 = vld [vmem:[#allocation5 + $0x3a0] sm:$0xff]  ;;  %v2758_v32 = vcombine.high %v337_v22, %v341_v23  ;;  %v417_v23 = vld [vmem:[#allocation5 + $0x348] sm:$0xff] }
  0xa5   : > { %1136 = vmatprep.subr.bf16.mxu1 %v2788_v33  ;;  %v432_v61 = vld [vmem:[#allocation5 + $0x3c0] sm:$0xff]  ;;  %v2844_v63 = vcombine.high %v424_v57, %v428_v58  ;;  %v2843_v0 = vcombine.low %v424_v57, %v428_v58  ;;  %v381_v57 = vld [vmem:[#allocation5 + $0x228] sm:$0xff] }
  0xa6   : > { %v436_v62 = vld [vmem:[#allocation5 + $0x3e0] sm:$0xff] }
  0xa7   : > { %v2852_v3 = vcombine.high %v432_v61, %v436_v62  ;;  %v288_v4 = vld [vmem:[%s3769_s8] sm:$0xff]  ;;  %v2851_v6 = vcombine.low %v432_v61, %v436_v62  ;;  %v389_v61 = vld [vmem:[#allocation5 + $0x268] sm:$0xff] }
  0xa8   : > { %1137 = vmatpush1.bf16.msra.mxu1 %v2787_v36  ;;  %v3792_v12 = vpack.c.bf16 %v290_v5, %v288_v4  ;;  %v292_v18 = vld [vmem:[%s3769_s8 + $0x20] sm:$0xff]  ;;  %v353_v36 = vld [vmem:[#allocation5 + $0x148] sm:$0xff] }
  0xa9   : > { %1138 = vmatprep.subr.bf16.mxu1 %v2796_v37  ;;  %v3802_v27 = vpack.c.bf16 %v294_v19, %v292_v18  ;;  %v296_v33 = vld [vmem:[%s3769_s8 + $0x40] sm:$0xff]  ;;  %v357_v37 = vld [vmem:[#allocation5 + $0x168] sm:$0xff]  ;;  %v2821_v19 = vcombine.low %v401_v8, %v405_v9 }
  0xaa   : > { %v3812_v41 = vpack.c.bf16 %v298_v34, %v296_v33  ;;  %v2774_v46 = vcombine.high %v353_v36, %v357_v37  ;;  %v3146_v62 = vld [vmem:[#allocation8 + $0x4] ss:$8 sps:$4 sm:$0xff]   ;;  %v3149_v4 = vld [vmem:[#allocation8 + $0x14] ss:$8 sps:$4 sm:$0xff]   ;;  %v2837_v34 = vcombine.low %v417_v23, %v421_v24  ;;  %v3181_v9 = vld [vmem:[#allocation8 + $0xb0] ss:$8 sps:$4 sm:$0xff]  }
  0xab   : > { %2290 = vmatprep.subr.bf16.mxu0 %v3146_v62  ;;  %v3155_v18 = vld [vmem:[#allocation8 + $0x34] ss:$8 sps:$4 sm:$0xff]   ;;  %v3176_v62 = vld [vmem:[#allocation8 + $0xa4] ss:$8 sps:$4 sm:$0xff]  }
  0xac   : > { %1139 = vmatpush1.bf16.msra.mxu1 %v2795_v40  ;;  %v2766_v40 = vcombine.high %v345_v29, %v349_v30  ;;  %v2838_v29 = vcombine.high %v417_v23, %v421_v24  ;;  %v425_v30 = vld [vmem:[#allocation5 + $0x388] sm:$0xff]  ;;  %v3161_v33 = vld [vmem:[#allocation8 + $0x54] ss:$8 sps:$4 sm:$0xff]  }
  0xad   : > { %1140 = vmatprep.subr.bf16.mxu1 %v2804_v43  ;;  %v361_v43 = vld [vmem:[#allocation5 + $0x188] sm:$0xff]  ;;  %v3179_v8 = vld [vmem:[#allocation8 + $0xb4] ss:$8 sps:$4 sm:$0xff]  }
  0xae   : > { %v3185_v23 = vld [vmem:[#allocation8 + $0xd4] ss:$8 sps:$4 sm:$0xff]  }
  0xb0   : > { %1141 = vmatpush1.bf16.msra.mxu1 %v2803_v44  ;;  %v365_v44 = vld [vmem:[#allocation5 + $0x1a8] sm:$0xff] }
  0xb1   : > { %1142 = vmatprep.subr.bf16.mxu1 %v2812_v47  ;;  %v2773_v47 = vcombine.low %v353_v36, %v357_v37  ;;  %v2782_v50 = vcombine.high %v361_v43, %v365_v44  ;;  %v2781_v54 = vcombine.low %v361_v43, %v365_v44  ;;  %v433_v37 = vld [vmem:[#allocation5 + $0x3c8] sm:$0xff]  ;;  %v314_v44 = vld [vmem:[#allocation5 + $0x10] sm:$0xff] }
  0xb2   : > { %v2854_v43 = vcombine.high %v433_v37, %v437_v38 }
  0xb4   : > { %1143 = vmatpush1.bf16.msra.mxu1 %v2811_v48  ;;  %v300_v48 = vld [vmem:[%s3769_s8 + $0x60] sm:$0xff] }
  0xb5   : > { %1144 = vmatprep.subr.bf16.mxu1 %v2820_v51  ;;  %v369_v51 = vld [vmem:[#allocation5 + $0x1c8] sm:$0xff]  ;;  %v3820_v53 = vpack.c.bf16 %v302_v49, %v300_v48  ;;  %v2853_v48 = vcombine.low %v433_v37, %v437_v38  ;;  %v3169_v49 = vld [vmem:[#allocation8 + $0x70] ss:$8 sps:$4 sm:$0xff]   ;;  %v3191_v37 = vld [vmem:[#allocation8 + $0xf4] ss:$8 sps:$4 sm:$0xff]  }
  0xb8   : > { %1145 = vmatpush1.bf16.msra.mxu1 %v2819_v52  ;;  %v373_v52 = vld [vmem:[#allocation5 + $0x1e8] sm:$0xff] }
  0xb9   : > { %1146 = vmatprep.subr.bf16.mxu1 %v2828_v55  ;;  %v2790_v55 = vcombine.high %v369_v51, %v373_v52  ;;  %v2789_v58 = vcombine.low %v369_v51, %v373_v52  ;;  %v322_v51 = vld [vmem:[#allocation5 + $0x50] sm:$0xff] }
  0xba   : > { %v326_v52 = vld [vmem:[#allocation5 + $0x70] sm:$0xff] }
  0xbc   : > { %1147 = vmatpush1.bf16.msra.mxu1 %v2827_v56  ;;  %v377_v56 = vld [vmem:[#allocation5 + $0x208] sm:$0xff] }
  0xbd   : > { %1148 = vmatprep.subr.bf16.mxu1 %v2836_v59  ;;  %v2798_v59 = vcombine.high %v377_v56, %v381_v57 }
  0xc0   : > { %1149 = vmatpush1.bf16.msra.mxu1 %v2835_v60  ;;  %v385_v60 = vld [vmem:[#allocation5 + $0x248] sm:$0xff] }
  0xc1   : > { %1150 = vmatprep.subr.bf16.mxu1 %v2844_v63  ;;  %v2797_v63 = vcombine.low %v377_v56, %v381_v57  ;;  %v2806_v1 = vcombine.high %v385_v60, %v389_v61  ;;  %v2805_v5 = vcombine.low %v385_v60, %v389_v61  ;;  %v3172_v56 = vld [vmem:[#allocation8 + $0x80] ss:$8 sps:$4 sm:$0xff]   ;;  %v2744_v57 = vcombine.high %v322_v51, %v326_v52  ;;  %v3173_v60 = vld [vmem:[#allocation8 + $0x94] ss:$8 sps:$4 sm:$0xff]   ;;  %v3175_v61 = vld [vmem:[#allocation8 + $0x90] ss:$8 sps:$4 sm:$0xff]  }
  0xc4   : > { %1151 = vmatpush1.bf16.msra.mxu1 %v2843_v0  ;;  %v3148_v0 = vld [vmem:[#allocation8] ss:$8 sps:$4 sm:$0xff]  }
  0xc5   : > { %1152 = vmatprep.subr.bf16.mxu1 %v2852_v3  ;;  %v397_v3 = vld [vmem:[#allocation5 + $0x2a8] sm:$0xff]  ;;  %2291 = vmatpush1.bf16.msra.mxu0 %v3148_v0 }
  0xc6   : > { %v2814_v7 = vcombine.high %v393_v2, %v397_v3  ;;  %2292 = vmatprep.subr.bf16.mxu0 %v3149_v4 }
  0xc8   : > { %1153 = vmatpush1.bf16.msra.mxu1 %v2851_v6  ;;  %v3151_v6 = vld [vmem:[#allocation8 + $0x10] ss:$8 sps:$4 sm:$0xff]  }
  0xc9   : > { %1195 = vmatprep.subr.bf16.mxu1 %v2734_v11  ;;  %2293 = vmatpush1.bf16.msra.mxu0 %v3151_v6  ;;  %v2813_v11 = vcombine.low %v393_v2, %v397_v3  ;;  %v342_v2 = vld [vmem:[#allocation5 + $0xf0] sm:$0xff] }
  0xca   : > { %2294 = vmatprep.subr.bf16.mxu0 %v3152_v10  ;;  %v3178_v3 = vld [vmem:[#allocation8 + $0xa0] ss:$8 sps:$4 sm:$0xff]   ;;  %v3182_v10 = vld [vmem:[#allocation8 + $0xc4] ss:$8 sps:$4 sm:$0xff]  }
  0xcb   : > { %1155 = vmatmul.mubr.bf16.vlgmr.msra.gmra.mrb[0].mxu1 %v3792_v12  ;;  %v346_v6 = vld [vmem:[#allocation5 + $0x110] sm:$0xff] }
  0xcc   : > { %1196 = vmatpush1.bf16.msra.mxu1 %v2733_v13  ;;  %1164 = vmatprep.mubr.bf16.mxu1 %v3794_v16  ;;  %v3154_v13 = vld [vmem:[#allocation8 + $0x20] ss:$8 sps:$4 sm:$0xff]  }
  0xcd   : > { %1197 = vmatprep.subr.bf16.mxu1 %v2742_v17  ;;  %v413_v17 = vld [vmem:[#allocation5 + $0x328] sm:$0xff]  ;;  %2295 = vmatpush1.bf16.msra.mxu0 %v3154_v13 }
  0xce   : > { %v2830_v22 = vcombine.high %v409_v15, %v413_v17  ;;  %2296 = vmatprep.subr.bf16.mxu0 %v3155_v18 }
  0xd0   : > { %1198 = vmatpush1.bf16.msra.mxu1 %v2741_v21  ;;  %v3157_v21 = vld [vmem:[#allocation8 + $0x30] ss:$8 sps:$4 sm:$0xff]  }
  0xd1   : > { %1199 = vmatprep.subr.bf16.mxu1 %v2750_v26  ;;  %2297 = vmatpush1.bf16.msra.mxu0 %v3157_v21  ;;  %v2829_v26 = vcombine.low %v409_v15, %v413_v17  ;;  %v358_v15 = vld [vmem:[#allocation5 + $0x170] sm:$0xff] }
  0xd2   : > { %2298 = vmatprep.subr.bf16.mxu0 %v3158_v25  ;;  %v3184_v17 = vld [vmem:[#allocation8 + $0xc0] ss:$8 sps:$4 sm:$0xff]   ;;  %v3187_v25 = vld [vmem:[#allocation8 + $0xd0] ss:$8 sps:$4 sm:$0xff]  }
  0xd3   : > { %1165 = vmatmul.mubr.bf16.gmra.mrb[4].mxu1 %v3802_v27  ;;  %v362_v21 = vld [vmem:[#allocation5 + $0x190] sm:$0xff] }
  0xd4   : > { %1200 = vmatpush1.bf16.msra.mxu1 %v2749_v28  ;;  %1174 = vmatprep.mubr.bf16.mxu1 %v3804_v31  ;;  %v3160_v28 = vld [vmem:[#allocation8 + $0x40] ss:$8 sps:$4 sm:$0xff]  }
  0xd5   : > { %1201 = vmatprep.subr.bf16.mxu1 %v2758_v32  ;;  %v429_v32 = vld [vmem:[#allocation5 + $0x3a8] sm:$0xff]  ;;  %2299 = vmatpush1.bf16.msra.mxu0 %v3160_v28  ;;  %v370_v28 = vld [vmem:[#allocation5 + $0x1d0] sm:$0xff] }
  0xd6   : > { %v2846_v36 = vcombine.high %v425_v30, %v429_v32  ;;  %2300 = vmatprep.subr.bf16.mxu0 %v3161_v33  ;;  %v3190_v33 = vld [vmem:[#allocation8 + $0xe0] ss:$8 sps:$4 sm:$0xff]  }
  0xd8   : > { %1202 = vmatpush1.bf16.msra.mxu1 %v2757_v35  ;;  %v3163_v35 = vld [vmem:[#allocation8 + $0x50] ss:$8 sps:$4 sm:$0xff]  }
  0xd9   : > { %1203 = vmatprep.subr.bf16.mxu1 %v2766_v40  ;;  %2301 = vmatpush1.bf16.msra.mxu0 %v3163_v35  ;;  %v2845_v40 = vcombine.low %v425_v30, %v429_v32  ;;  %v3188_v30 = vld [vmem:[#allocation8 + $0xe4] ss:$8 sps:$4 sm:$0xff]  }
  0xda   : > { %2302 = vmatprep.subr.bf16.mxu0 %v3164_v39  ;;  %v378_v35 = vld [vmem:[#allocation5 + $0x210] sm:$0xff]  ;;  %v3193_v39 = vld [vmem:[#allocation8 + $0xf0] ss:$8 sps:$4 sm:$0xff]  }
  0xdb   : > { %1175 = vmatmul.mubr.bf16.gmra.mrb[8].mxu1 %v3812_v41 }
  0xdc   : > { %1204 = vmatpush1.bf16.msra.mxu1 %v2765_v42  ;;  %1184 = vmatprep.mubr.bf16.mxu1 %v3814_v45  ;;  %v3166_v42 = vld [vmem:[#allocation8 + $0x60] ss:$8 sps:$4 sm:$0xff]  }
  0xdd   : > { %1205 = vmatprep.subr.bf16.mxu1 %v2774_v46  ;;  %v318_v46 = vld [vmem:[#allocation5 + $0x30] sm:$0xff]  ;;  %2303 = vmatpush1.bf16.msra.mxu0 %v3166_v42 }
  0xde   : > { %v386_v42 = vld [vmem:[#allocation5 + $0x250] sm:$0xff] }
  0xe0   : > { %1206 = vmatpush1.bf16.msra.mxu1 %v2773_v47  ;;  %v3167_v47 = vld [vmem:[#allocation8 + $0x74] ss:$8 sps:$4 sm:$0xff]  }
  0xe1   : > { %1207 = vmatprep.subr.bf16.mxu1 %v2782_v50  ;;  %v2736_v50 = vcombine.high %v314_v44, %v318_v46  ;;  %2304 = vmatprep.subr.bf16.mxu0 %v3167_v47 }
  0xe2   : > { %2305 = vmatpush1.bf16.msra.mxu0 %v3169_v49  ;;  %v398_v49 = vld [vmem:[#allocation5 + $0x2b0] sm:$0xff] }
  0xe3   : > { %1185 = vmatmul.mubr.bf16.gmra.mrb[12].mxu1 %v3820_v53 }
  0xe4   : > { %1208 = vmatpush1.bf16.msra.mxu1 %v2781_v54  ;;  %1227 = vmatprep.mubr.bf16.mxu1 %v3785_v20  ;;  %v3170_v54 = vld [vmem:[#allocation8 + $0x84] ss:$8 sps:$4 sm:$0xff]  }
  0xe5   : > { %1209 = vmatprep.subr.bf16.mxu1 %v2790_v55  ;;  %v2735_v55 = vcombine.low %v314_v44, %v318_v46  ;;  %2306 = vmatprep.subr.bf16.mxu0 %v3170_v54  ;;  %v3196_v44 = vld [vmem:[#allocation8 + $0x104] ss:$8 sps:$4 sm:$0xff]  }
  0xe6   : > { %2307 = vmatpush1.bf16.msra.mxu0 %v3172_v56  ;;  %v406_v54 = vld [vmem:[#allocation5 + $0x2f0] sm:$0xff] }
  0xe7   : > { %2308 = vmatprep.subr.bf16.mxu0 %v3173_v60 }
  0xe8   : > { %1210 = vmatpush1.bf16.msra.mxu1 %v2789_v58  ;;  %v330_v58 = vld [vmem:[#allocation5 + $0x90] sm:$0xff] }
  0xe9   : > { %1211 = vmatprep.subr.bf16.mxu1 %v2798_v59  ;;  %v334_v59 = vld [vmem:[#allocation5 + $0xb0] sm:$0xff] }
  0xea   : > { %v2752_v0 = vcombine.high %v330_v58, %v334_v59  ;;  %2309 = vmatpush1.bf16.msra.mxu0 %v3175_v61  ;;  %v2751_v4 = vcombine.low %v330_v58, %v334_v59  ;;  %v414_v58 = vld [vmem:[#allocation5 + $0x330] sm:$0xff] }
  0xeb   : > { %2310 = vmatprep.subr.bf16.mxu0 %v3176_v62  ;;  %v418_v61 = vld [vmem:[#allocation5 + $0x350] sm:$0xff] }
  0xec   : > { %1212 = vmatpush1.bf16.msra.mxu1 %v2797_v63  ;;  %v2743_v63 = vcombine.low %v322_v51, %v326_v52  ;;  %v402_v52 = vld [vmem:[#allocation5 + $0x2d0] sm:$0xff] }
  0xed   : > { %1213 = vmatprep.subr.bf16.mxu1 %v2806_v1  ;;  %v338_v1 = vld [vmem:[#allocation5 + $0xd0] sm:$0xff]  ;;  %v2824_v56 = vcombine.high %v402_v52, %v406_v54  ;;  %v2823_v59 = vcombine.low %v402_v52, %v406_v54  ;;  %v387_v52 = vld [vmem:[#allocation5 + $0x258] sm:$0xff] }
  0xee   : > { %2311 = vmatpush1.bf16.msra.mxu0 %v3178_v3  ;;  %v422_v62 = vld [vmem:[#allocation5 + $0x370] sm:$0xff]  ;;  %v391_v54 = vld [vmem:[#allocation5 + $0x278] sm:$0xff] }
  0xef   : > { %2312 = vmatprep.subr.bf16.mxu0 %v3179_v8  ;;  %v2839_v3 = vcombine.low %v418_v61, %v422_v62 }
  0xf0   : > { %1214 = vmatpush1.bf16.msra.mxu1 %v2805_v5  ;;  %v2760_v5 = vcombine.high %v338_v1, %v342_v2 }
  0xf1   : > { %1215 = vmatprep.subr.bf16.mxu1 %v2814_v7  ;;  %v350_v7 = vld [vmem:[#allocation5 + $0x130] sm:$0xff] }
  0xf2   : > { %v2768_v13 = vcombine.high %v346_v6, %v350_v7  ;;  %2313 = vmatpush1.bf16.msra.mxu0 %v3181_v9  ;;  %v2767_v18 = vcombine.low %v346_v6, %v350_v7  ;;  %v438_v6 = vld [vmem:[#allocation5 + $0x3f0] sm:$0xff]  ;;  %v315_v9 = vld [vmem:[#allocation5 + $0x18] sm:$0xff] }
  0xf3   : > { %2314 = vmatprep.subr.bf16.mxu0 %v3182_v10  ;;  %v319_v10 = vld [vmem:[#allocation5 + $0x38] sm:$0xff] }
  0xf4   : > { %1216 = vmatpush1.bf16.msra.mxu1 %v2813_v11  ;;  %v2759_v11 = vcombine.low %v338_v1, %v342_v2  ;;  %v426_v1 = vld [vmem:[#allocation5 + $0x390] sm:$0xff] }
  0xf5   : > { %1217 = vmatprep.subr.bf16.mxu1 %v2822_v14  ;;  %v354_v14 = vld [vmem:[#allocation5 + $0x150] sm:$0xff] }
  0xf6   : > { %2315 = vmatpush1.bf16.msra.mxu0 %v3184_v17  ;;  %v2775_v24 = vcombine.low %v354_v14, %v358_v15  ;;  %v430_v2 = vld [vmem:[#allocation5 + $0x3b0] sm:$0xff]  ;;  %v2737_v17 = vcombine.low %v315_v9, %v319_v10 }
  0xf7   : > { %2316 = vmatprep.subr.bf16.mxu0 %v3185_v23  ;;  %v2847_v7 = vcombine.low %v426_v1, %v430_v2 }
  0xf8   : > { %1218 = vmatpush1.bf16.msra.mxu1 %v2821_v19  ;;  %v2776_v19 = vcombine.high %v354_v14, %v358_v15  ;;  %v323_v14 = vld [vmem:[#allocation5 + $0x58] sm:$0xff] }
  0xf9   : > { %1219 = vmatprep.subr.bf16.mxu1 %v2830_v22  ;;  %v366_v22 = vld [vmem:[#allocation5 + $0x1b0] sm:$0xff]  ;;  %v327_v15 = vld [vmem:[#allocation5 + $0x78] sm:$0xff] }
  0xfa   : > { %2317 = vmatpush1.bf16.msra.mxu0 %v3187_v25  ;;  %v2783_v32 = vcombine.low %v362_v21, %v366_v22  ;;  %v343_v25 = vld [vmem:[#allocation5 + $0xf8] sm:$0xff] }
  0xfb   : > { %2318 = vmatprep.subr.bf16.mxu0 %v3188_v30  ;;  %v351_v30 = vld [vmem:[#allocation5 + $0x138] sm:$0xff] }
  0xfc   : > { %1220 = vmatpush1.bf16.msra.mxu1 %v2829_v26  ;;  %v2784_v26 = vcombine.high %v362_v21, %v366_v22  ;;  %v335_v21 = vld [vmem:[#allocation5 + $0xb8] sm:$0xff]  ;;  %v2745_v22 = vcombine.low %v323_v14, %v327_v15 }
  0xfd   : > { %1221 = vmatprep.subr.bf16.mxu1 %v2838_v29  ;;  %v374_v29 = vld [vmem:[#allocation5 + $0x1f0] sm:$0xff] }
  0xfe   : > { %2319 = vmatpush1.bf16.msra.mxu0 %v3190_v33  ;;  %v2791_v38 = vcombine.low %v370_v28, %v374_v29 }
  0xff   : > { %2320 = vmatprep.subr.bf16.mxu0 %v3191_v37 }
 0x100   : > { %1222 = vmatpush1.bf16.msra.mxu1 %v2837_v34  ;;  %v2792_v34 = vcombine.high %v370_v28, %v374_v29  ;;  %v347_v29 = vld [vmem:[#allocation5 + $0x118] sm:$0xff] }
 0x101   : > { %1223 = vmatprep.subr.bf16.mxu1 %v2846_v36  ;;  %v382_v36 = vld [vmem:[#allocation5 + $0x230] sm:$0xff]  ;;  %v2770_v33 = vcombine.high %v347_v29, %v351_v30 }
 0x102   : > { %2321 = vmatpush1.bf16.msra.mxu0 %v3193_v39  ;;  %v2799_v46 = vcombine.low %v378_v35, %v382_v36  ;;  %v367_v39 = vld [vmem:[#allocation5 + $0x1b8] sm:$0xff] }
 0x103   : > { %2363 = vmatprep.subr.bf16.mxu0 %v3196_v44  ;;  %v375_v44 = vld [vmem:[#allocation5 + $0x1f8] sm:$0xff] }
 0x104   : > { %1224 = vmatpush1.bf16.msra.mxu1 %v2845_v40  ;;  %v2800_v40 = vcombine.high %v378_v35, %v382_v36  ;;  %v359_v35 = vld [vmem:[#allocation5 + $0x178] sm:$0xff]  ;;  %v2769_v36 = vcombine.low %v347_v29, %v351_v30 }
 0x105   : > { %1225 = vmatprep.subr.bf16.mxu1 %v2854_v43  ;;  %v390_v43 = vld [vmem:[#allocation5 + $0x270] sm:$0xff] }
 0x106   : > { %v2808_v47 = vcombine.high %v386_v42, %v390_v43 }
 0x108   : > { %1226 = vmatpush1.bf16.msra.mxu1 %v2853_v48  ;;  %v394_v48 = vld [vmem:[#allocation5 + $0x290] sm:$0xff] }
 0x109   : > { %1268 = vmatprep.subr.bf16.mxu1 %v2736_v50  ;;  %v2807_v50 = vcombine.low %v386_v42, %v390_v43  ;;  %v2816_v51 = vcombine.high %v394_v48, %v398_v49  ;;  %v371_v43 = vld [vmem:[#allocation5 + $0x1d8] sm:$0xff] }
 0x10b   : > { %1228 = vmatmul.mubr.bf16.vlgmr.msra.gmra.mrb[16].mxu1 %v3792_v12 }
 0x10c   : > { %1269 = vmatpush1.bf16.msra.mxu1 %v2735_v55  ;;  %1237 = vmatprep.mubr.bf16.mxu1 %v3794_v16  ;;  %v2815_v55 = vcombine.low %v394_v48, %v398_v49  ;;  %v379_v48 = vld [vmem:[#allocation5 + $0x218] sm:$0xff] }
 0x10d   : > { %1270 = vmatprep.subr.bf16.mxu1 %v2744_v57  ;;  %v410_v57 = vld [vmem:[#allocation5 + $0x310] sm:$0xff]  ;;  %v383_v49 = vld [vmem:[#allocation5 + $0x238] sm:$0xff] }
 0x10e   : > { %v2832_v60 = vcombine.high %v410_v57, %v414_v58 }
 0x110   : > { %1271 = vmatpush1.bf16.msra.mxu1 %v2743_v63  ;;  %v2831_v63 = vcombine.low %v410_v57, %v414_v58  ;;  %v395_v57 = vld [vmem:[#allocation5 + $0x298] sm:$0xff] }
 0x111   : > { %1272 = vmatprep.subr.bf16.mxu1 %v2752_v0  ;;  %v2840_v0 = vcombine.high %v418_v61, %v422_v62  ;;  %v399_v58 = vld [vmem:[#allocation5 + $0x2b8] sm:$0xff] }
 0x112   : > { %v403_v61 = vld [vmem:[#allocation5 + $0x2d8] sm:$0xff] }
 0x113   : > { %1238 = vmatmul.mubr.bf16.gmra.mrb[20].mxu1 %v3802_v27  ;;  %v407_v62 = vld [vmem:[#allocation5 + $0x2f8] sm:$0xff] }
 0x114   : > { %1273 = vmatpush1.bf16.msra.mxu1 %v2751_v4  ;;  %1247 = vmatprep.mubr.bf16.mxu1 %v3804_v31  ;;  %v2848_v4 = vcombine.high %v426_v1, %v430_v2  ;;  %v415_v1 = vld [vmem:[#allocation5 + $0x338] sm:$0xff]  ;;  %v2825_v2 = vcombine.low %v403_v61, %v407_v62 }
 0x115   : > { %1274 = vmatprep.subr.bf16.mxu1 %v2760_v5  ;;  %v434_v5 = vld [vmem:[#allocation5 + $0x3d0] sm:$0xff] }
 0x116   : > { %v2856_v8 = vcombine.high %v434_v5, %v438_v6 }
 0x118   : > { %1275 = vmatpush1.bf16.msra.mxu1 %v2759_v11  ;;  %v2855_v11 = vcombine.low %v434_v5, %v438_v6  ;;  %v423_v5 = vld [vmem:[#allocation5 + $0x378] sm:$0xff] }
 0x119   : > { %1276 = vmatprep.subr.bf16.mxu1 %v2768_v13  ;;  %v2738_v13 = vcombine.high %v315_v9, %v319_v10  ;;  %v431_v9 = vld [vmem:[#allocation5 + $0x3b8] sm:$0xff] }
 0x11b   : > { %1248 = vmatmul.mubr.bf16.gmra.mrb[24].mxu1 %v3812_v41 }
 0x11c   : > { %1277 = vmatpush1.bf16.msra.mxu1 %v2767_v18  ;;  %1257 = vmatprep.mubr.bf16.mxu1 %v3814_v45  ;;  %v2746_v18 = vcombine.high %v323_v14, %v327_v15  ;;  %v439_v14 = vld [vmem:[#allocation5 + $0x3f8] sm:$0xff] }
 0x11d   : > { %1278 = vmatprep.subr.bf16.mxu1 %v2776_v19  ;;  %v331_v19 = vld [vmem:[#allocation5 + $0x98] sm:$0xff] }
 0x11e   : > { %v2754_v23 = vcombine.high %v331_v19, %v335_v21 }
 0x120   : > { %1279 = vmatpush1.bf16.msra.mxu1 %v2775_v24  ;;  %v339_v24 = vld [vmem:[#allocation5 + $0xd8] sm:$0xff] }
 0x121   : > { %1280 = vmatprep.subr.bf16.mxu1 %v2784_v26  ;;  %v2753_v26 = vcombine.low %v331_v19, %v335_v21  ;;  %v2762_v28 = vcombine.high %v339_v24, %v343_v25  ;;  %v442_v19 = vlaneseq }
 0x123   : > { %1258 = vmatmul.mubr.bf16.gmra.mrb[28].mxu1 %v3820_v53  ;;  %v3843_v21 = vshrl.u32 %v442_v19, 7 }
 0x124   : > { %1281 = vmatpush1.bf16.msra.mxu1 %v2783_v32  ;;  %1300 = vmatprep.mubr.bf16.mxu1 %v3785_v20  ;;  %v2761_v32 = vcombine.low %v339_v24, %v343_v25 }
 0x125   : > { %1282 = vmatprep.subr.bf16.mxu1 %v2792_v34  ;;  %v355_v34 = vld [vmem:[#allocation5 + $0x158] sm:$0xff]  ;;  %v448_v24 = vsub.s32 1, %v3843_v21 }
 0x126   : > { %v2778_v37 = vcombine.high %v355_v34, %v359_v35 }
 0x128   : > { %1283 = vmatpush1.bf16.msra.mxu1 %v2791_v38  ;;  %v363_v38 = vld [vmem:[#allocation5 + $0x198] sm:$0xff] }
 0x129   : > { %1284 = vmatprep.subr.bf16.mxu1 %v2800_v40  ;;  %v2777_v40 = vcombine.low %v355_v34, %v359_v35  ;;  %v2786_v42 = vcombine.high %v363_v38, %v367_v39 }
 0x12c   : > { %1285 = vmatpush1.bf16.msra.mxu1 %v2799_v46  ;;  %v2785_v46 = vcombine.low %v363_v38, %v367_v39  ;;  %v3199_v39 = vld [vmem:[#allocation8 + $0x114] ss:$8 sps:$4 sm:$0xff]  }
 0x12d   : > { %1286 = vmatprep.subr.bf16.mxu1 %v2808_v47  ;;  %v2794_v47 = vcombine.high %v371_v43, %v375_v44 }
 0x130   : > { %1287 = vmatpush1.bf16.msra.mxu1 %v2807_v50  ;;  %v2793_v50 = vcombine.low %v371_v43, %v375_v44 }
 0x131   : > { %1288 = vmatprep.subr.bf16.mxu1 %v2816_v51  ;;  %v2802_v51 = vcombine.high %v379_v48, %v383_v49 }
 0x134   : > { %1289 = vmatpush1.bf16.msra.mxu1 %v2815_v55  ;;  %v2801_v55 = vcombine.low %v379_v48, %v383_v49 }
 0x135   : > { %1290 = vmatprep.subr.bf16.mxu1 %v2824_v56  ;;  %v2810_v56 = vcombine.high %v387_v52, %v391_v54 }
 0x138   : > { %1291 = vmatpush1.bf16.msra.mxu1 %v2823_v59  ;;  %v2809_v59 = vcombine.low %v387_v52, %v391_v54 }
 0x139   : > { %1292 = vmatprep.subr.bf16.mxu1 %v2832_v60  ;;  %v2818_v60 = vcombine.high %v395_v57, %v399_v58 }
 0x13c   : > { %1293 = vmatpush1.bf16.msra.mxu1 %v2831_v63  ;;  %v2817_v63 = vcombine.low %v395_v57, %v399_v58 }
 0x13d   : > { %1294 = vmatprep.subr.bf16.mxu1 %v2840_v0  ;;  %v411_v0 = vld [vmem:[#allocation5 + $0x318] sm:$0xff] }
 0x13e   : > { %v2833_v6 = vcombine.low %v411_v0, %v415_v1 }
 0x140   : > { %1295 = vmatpush1.bf16.msra.mxu1 %v2839_v3  ;;  %v2834_v3 = vcombine.high %v411_v0, %v415_v1 }
 0x141   : > { %1296 = vmatprep.subr.bf16.mxu1 %v2848_v4  ;;  %v419_v4 = vld [vmem:[#allocation5 + $0x358] sm:$0xff] }
 0x142   : > { %v2841_v10 = vcombine.low %v419_v4, %v423_v5 }
 0x144   : > { %1297 = vmatpush1.bf16.msra.mxu1 %v2847_v7  ;;  %v2842_v7 = vcombine.high %v419_v4, %v423_v5  ;;  %v3208_v5 = vld [vmem:[#allocation8 + $0x144] ss:$8 sps:$4 sm:$0xff]  }
 0x145   : > { %1298 = vmatprep.subr.bf16.mxu1 %v2856_v8  ;;  %v427_v8 = vld [vmem:[#allocation5 + $0x398] sm:$0xff] }
 0x146   : > { %v2849_v15 = vcombine.low %v427_v8, %v431_v9 }
 0x148   : > { %1299 = vmatpush1.bf16.msra.mxu1 %v2855_v11  ;;  %v2850_v11 = vcombine.high %v427_v8, %v431_v9  ;;  %v3206_v9 = vld [vmem:[#allocation8 + $0x140] ss:$8 sps:$4 sm:$0xff]  }
 0x149   : > { %1341 = vmatprep.subr.bf16.mxu1 %v2738_v13  ;;  %v435_v13 = vld [vmem:[#allocation5 + $0x3d8] sm:$0xff] }
 0x14b   : > { %1301 = vmatmul.mubr.bf16.vlgmr.msra.gmra.mrb[32].mxu1 %v3792_v12 }
 0x14c   : > { %1342 = vmatpush1.bf16.msra.mxu1 %v2737_v17  ;;  %1310 = vmatprep.mubr.bf16.mxu1 %v3794_v16  ;;  %v2858_v17 = vcombine.high %v435_v13, %v439_v14 }
 0x14d   : > { %1343 = vmatprep.subr.bf16.mxu1 %v2746_v18  ;;  %v2857_v18 = vcombine.low %v435_v13, %v439_v14  ;;  %v3211_v13 = vld [vmem:[#allocation8 + $0x154] ss:$8 sps:$4 sm:$0xff]  }
 0x150   : > { %1344 = vmatpush1.bf16.msra.mxu1 %v2745_v22  ;;  %v444_v22 = vsub.s32 0, %v3843_v21 }
 0x151   : > { %1345 = vmatprep.subr.bf16.mxu1 %v2754_v23  ;;  %v3847_v23 = vld [vmem:[#allocation7] sm:$0xff] }
 0x153   : > { %1311 = vmatmul.mubr.bf16.gmra.mrb[36].mxu1 %v3802_v27 }
 0x154   : > { %1346 = vmatpush1.bf16.msra.mxu1 %v2753_v26  ;;  %1320 = vmatprep.mubr.bf16.mxu1 %v3804_v31 }
 0x155   : > { %1347 = vmatprep.subr.bf16.mxu1 %v2762_v28 }
 0x158   : > { %1348 = vmatpush1.bf16.msra.mxu1 %v2761_v32 }
 0x159   : > { %1349 = vmatprep.subr.bf16.mxu1 %v2770_v33 }
 0x15b   : > { %1321 = vmatmul.mubr.bf16.gmra.mrb[40].mxu1 %v3812_v41 }
 0x15c   : > { %1350 = vmatpush1.bf16.msra.mxu1 %v2769_v36  ;;  %1330 = vmatprep.mubr.bf16.mxu1 %v3814_v45 }
 0x15d   : > { %1351 = vmatprep.subr.bf16.mxu1 %v2778_v37  ;;  %v3194_v37 = vld [vmem:[#allocation8 + $0x100] ss:$8 sps:$4 sm:$0xff]  }
 0x160   : > { %1352 = vmatpush1.bf16.msra.mxu1 %v2777_v40 }
 0x161   : > { %1353 = vmatprep.subr.bf16.mxu1 %v2786_v42 }
 0x163   : > { %1331 = vmatmul.mubr.bf16.gmra.mrb[44].mxu1 %v3820_v53 }
 0x164   : > { %1354 = vmatpush1.bf16.msra.mxu1 %v2785_v46  ;;  %1373 = vmatprep.mubr.bf16.mxu1 %v3785_v20  ;;  %v2826_v20 = vcombine.high %v403_v61, %v407_v62 }
 0x165   : > { %1355 = vmatprep.subr.bf16.mxu1 %v2794_v47 }
 0x168   : > { %1356 = vmatpush1.bf16.msra.mxu1 %v2793_v50 }
 0x169   : > { %1357 = vmatprep.subr.bf16.mxu1 %v2802_v51  ;;  %v3202_v51 = vld [vmem:[#allocation8 + $0x124] ss:$8 sps:$4 sm:$0xff]  }
 0x16c   : > { %1358 = vmatpush1.bf16.msra.mxu1 %v2801_v55 }
 0x16d   : > { %1359 = vmatprep.subr.bf16.mxu1 %v2810_v56  ;;  %v3200_v56 = vld [vmem:[#allocation8 + $0x120] ss:$8 sps:$4 sm:$0xff]  }
 0x170   : > { %1360 = vmatpush1.bf16.msra.mxu1 %v2809_v59  ;;  %v3205_v59 = vld [vmem:[#allocation8 + $0x134] ss:$8 sps:$4 sm:$0xff]  }
 0x171   : > { %1361 = vmatprep.subr.bf16.mxu1 %v2818_v60 }
 0x174   : > { %1362 = vmatpush1.bf16.msra.mxu1 %v2817_v63 }
 0x175   : > { %1363 = vmatprep.subr.bf16.mxu1 %v2826_v20 }
 0x178   : > { %1364 = vmatpush1.bf16.msra.mxu1 %v2825_v2  ;;  %v3203_v2 = vld [vmem:[#allocation8 + $0x130] ss:$8 sps:$4 sm:$0xff]  }
 0x179   : > { %1365 = vmatprep.subr.bf16.mxu1 %v2834_v3 }
 0x17c   : > { %1366 = vmatpush1.bf16.msra.mxu1 %v2833_v6 }
 0x17d   : > { %1367 = vmatprep.subr.bf16.mxu1 %v2842_v7 }
 0x180   : > { %1368 = vmatpush1.bf16.msra.mxu1 %v2841_v10 }
 0x181   : > { %1369 = vmatprep.subr.bf16.mxu1 %v2850_v11 }
 0x184   : > { %1370 = vmatpush1.bf16.msra.mxu1 %v2849_v15 }
 0x185   : > { %1371 = vmatprep.subr.bf16.mxu1 %v2858_v17 }
 0x188   : > { %1372 = vmatpush1.bf16.msra.mxu1 %v2857_v18 }
 0x18b   : > { %1374 = vmatmul.mubr.bf16.vlgmr.msra.gmra.mrb[48].mxu1 %v3792_v12  ;;  %v3854_v12 = vrot.slane %v3847_v23, %v444_v22 }
 0x18c   : > { %1383 = vmatprep.mubr.bf16.mxu1 %v3794_v16  ;;  %v3859_v16 = vrot.slane %v3847_v23, %v448_v24 }
 0x193   : > { %1384 = vmatmul.mubr.bf16.gmra.mrb[52].mxu1 %v3802_v27 }
 0x194   : > { %1393 = vmatprep.mubr.bf16.mxu1 %v3804_v31 }
 0x19b   : > { %1394 = vmatmul.mubr.bf16.gmra.mrb[56].mxu1 %v3812_v41 }
 0x19c   : > { %1403 = vmatprep.mubr.bf16.mxu1 %v3814_v45 }
 0x19e   : > { %v1156_v27 = vpop.f32.mrb[0].mxu1 }
 0x19f   : > { %v1157_v31 = vadd.f32 %v1156_v27, %v3854_v12  ;;  %v1158_v25 = vpop.f32.mrb[1].mxu1 }
 0x1a0   : > { %v1159_v26 = vadd.f32 %v1158_v25, %v3859_v16  ;;  %v1160_v28 = vpop.f32.mrb[2].mxu1  ;;  %v3209_v25 = vld [vmem:[#allocation8 + $0x150] ss:$8 sps:$4 sm:$0xff]  }
 0x1a1   : > { %v1414_v41 = vmax.f32 %v1157_v31, 0.0  ;;  %v1161_v29 = vadd.f32 %v1160_v28, %v3854_v12  ;;  %v1162_v30 = vpop.f32.mrb[3].mxu1 }
 0x1a2   : > { %v1163_v32 = vadd.f32 %v1162_v30, %v3859_v16  ;;  %v1415_v34 = vmax.f32 %v1159_v26, 0.0 }
 0x1a3   : > { %v1422_v33 = vmax.f32 %v1161_v29, 0.0  ;;  %1404 = vmatmul.mubr.bf16.gmra.mrb[60].mxu1 %v3820_v53  ;;  %v3197_v53 = vld [vmem:[#allocation8 + $0x110] ss:$8 sps:$4 sm:$0xff]  }
 0x1a4   : > { %v1423_v35 = vmax.f32 %v1163_v32, 0.0 }
 0x1a5   : > { %v1478_v36 = vpack.c.bf16 %v1422_v33, %v1414_v41  ;;  %v3214_v41 = vld [vmem:[#allocation8 + $0x164] ss:$8 sps:$4 sm:$0xff]   ;;  %v3212_v33 = vld [vmem:[#allocation8 + $0x160] ss:$8 sps:$4 sm:$0xff]  }
 0x1a6   : > { %v1479_v45 = vpack.c.bf16 %v1423_v35, %v1415_v34  ;;  %v1166_v38 = vpop.f32.mrb[4].mxu1  ;;  %v3217_v35 = vld [vmem:[#allocation8 + $0x174] ss:$8 sps:$4 sm:$0xff]  }
 0x1a7   : > { %v1167_v40 = vadd.f32 %v1166_v38, %v3854_v12  ;;  %v1168_v42 = vpop.f32.mrb[5].mxu1  ;;  %v3226_v38 = vld [vmem:[#allocation8 + $0x1a4] ss:$8 sps:$4 sm:$0xff]  }
 0x1a8   : > { %2322 = vmatprep.mubr.bf16.mxu0 %v1479_v45  ;;  %v1169_v43 = vadd.f32 %v1168_v42, %v3859_v16  ;;  %v1170_v44 = vpop.f32.mrb[6].mxu1  ;;  %v3218_v45 = vld [vmem:[#allocation8 + $0x180] ss:$8 sps:$4 sm:$0xff]   ;;  %v3227_v42 = vld [vmem:[#allocation8 + $0x1b0] ss:$8 sps:$4 sm:$0xff]  }
 0x1a9   : > { %2323 = vmatmul.mubr.bf16.vlgmr.msra.gmra.mrb[0].mxu0 %v1478_v36  ;;  %v1430_v46 = vmax.f32 %v1167_v40, 0.0  ;;  %v1171_v47 = vadd.f32 %v1170_v44, %v3854_v12  ;;  %v1172_v48 = vpop.f32.mrb[7].mxu1  ;;  %v3220_v36 = vld [vmem:[#allocation8 + $0x184] ss:$8 sps:$4 sm:$0xff]   ;;  %v3229_v40 = vld [vmem:[#allocation8 + $0x1b4] ss:$8 sps:$4 sm:$0xff]  }
 0x1aa   : > { %2364 = vmatpush1.bf16.msra.mxu0 %v3194_v37  ;;  %v1431_v49 = vmax.f32 %v1169_v43, 0.0  ;;  %v1173_v50 = vadd.f32 %v1172_v48, %v3859_v16  ;;  %v3221_v37 = vld [vmem:[#allocation8 + $0x190] ss:$8 sps:$4 sm:$0xff]   ;;  %v3232_v43 = vld [vmem:[#allocation8 + $0x1c4] ss:$8 sps:$4 sm:$0xff]   ;;  %v456_v48 = vsub.s32 3, %v3843_v21 }
 0x1ab   : > { %2365 = vmatprep.subr.bf16.mxu0 %v3199_v39  ;;  %v1438_v52 = vmax.f32 %v1171_v47, 0.0  ;;  %v3224_v39 = vld [vmem:[#allocation8 + $0x1a0] ss:$8 sps:$4 sm:$0xff]   ;;  %v452_v47 = vsub.s32 2, %v3843_v21 }
 0x1ac   : > { %v1439_v54 = vmax.f32 %v1173_v50, 0.0  ;;  %v3230_v44 = vld [vmem:[#allocation8 + $0x1c0] ss:$8 sps:$4 sm:$0xff]   ;;  %v3238_v50 = vld [vmem:[#allocation8 + $0x1e4] ss:$8 sps:$4 sm:$0xff]  }
 0x1ad   : > { %v1486_v55 = vpack.c.bf16 %v1438_v52, %v1430_v46  ;;  %v3235_v46 = vld [vmem:[#allocation8 + $0x1d4] ss:$8 sps:$4 sm:$0xff]  }
 0x1ae   : > { %2366 = vmatpush1.bf16.msra.mxu0 %v3197_v53  ;;  %v1487_v57 = vpack.c.bf16 %v1439_v54, %v1431_v49  ;;  %v1176_v58 = vpop.f32.mrb[8].mxu1  ;;  %v3233_v53 = vld [vmem:[#allocation8 + $0x1d0] ss:$8 sps:$4 sm:$0xff]   ;;  %v3882_v49 = vrot.slane %v3847_v23, %v452_v47  ;;  %v3236_v54 = vld [vmem:[#allocation8 + $0x1e0] ss:$8 sps:$4 sm:$0xff]  }
 0x1af   : > { %2367 = vmatprep.subr.bf16.mxu0 %v3202_v51  ;;  %v1177_v60 = vadd.f32 %v1176_v58, %v3854_v12  ;;  %v1178_v61 = vpop.f32.mrb[9].mxu1  ;;  %v3885_v51 = vrot.slane %v3847_v23, %v456_v48 }
 0x1b0   : > { %v1179_v62 = vadd.f32 %v1178_v61, %v3859_v16  ;;  %v1180_v63 = vpop.f32.mrb[10].mxu1  ;;  %2332 = vmatprep.mubr.bf16.mxu0 %v1487_v57  ;;  %v3241_v57 = vld [vmem:[#allocation8 + $0x1f4] ss:$8 sps:$4 sm:$0xff]  }
 0x1b1   : > { %v1446_v20 = vmax.f32 %v1177_v60, 0.0  ;;  %v1181_v0 = vadd.f32 %v1180_v63, %v3854_v12  ;;  %v1182_v1 = vpop.f32.mrb[11].mxu1  ;;  %2333 = vmatmul.mubr.bf16.gmra.mrb[4].mxu0 %v1486_v55 }
 0x1b2   : > { %2368 = vmatpush1.bf16.msra.mxu0 %v3200_v56  ;;  %v1447_v3 = vmax.f32 %v1179_v62, 0.0  ;;  %v1183_v4 = vadd.f32 %v1182_v1, %v3859_v16  ;;  %v3244_v1 = vld [vmem:[#allocation8 + $0x204] ss:$8 sps:$4 sm:$0xff]  }
 0x1b3   : > { %2369 = vmatprep.subr.bf16.mxu0 %v3205_v59  ;;  %v1454_v6 = vmax.f32 %v1181_v0, 0.0 }
 0x1b4   : > { %v1455_v7 = vmax.f32 %v1183_v4, 0.0 }
 0x1b5   : > { %v1494_v8 = vpack.c.bf16 %v1454_v6, %v1446_v20  ;;  %v3239_v20 = vld [vmem:[#allocation8 + $0x1f0] ss:$8 sps:$4 sm:$0xff]   ;;  %v3242_v6 = vld [vmem:[#allocation8 + $0x200] ss:$8 sps:$4 sm:$0xff]  }
 0x1b6   : > { %2370 = vmatpush1.bf16.msra.mxu0 %v3203_v2  ;;  %v1495_v10 = vpack.c.bf16 %v1455_v7, %v1447_v3  ;;  %v1186_v11 = vpop.f32.mrb[12].mxu1 }
 0x1b7   : > { %2371 = vmatprep.subr.bf16.mxu0 %v3208_v5  ;;  %v1187_v14 = vadd.f32 %v1186_v11, %v3854_v12  ;;  %v1188_v15 = vpop.f32.mrb[13].mxu1 }
 0x1b8   : > { %v1189_v17 = vadd.f32 %v1188_v15, %v3859_v16  ;;  %v1190_v18 = vpop.f32.mrb[14].mxu1  ;;  %2342 = vmatprep.mubr.bf16.mxu0 %v1495_v10 }
 0x1b9   : > { %v1462_v19 = vmax.f32 %v1187_v14, 0.0  ;;  %v1191_v27 = vadd.f32 %v1190_v18, %v3854_v12  ;;  %v1192_v31 = vpop.f32.mrb[15].mxu1  ;;  %2343 = vmatmul.mubr.bf16.gmra.mrb[8].mxu0 %v1494_v8  ;;  %v3215_v12 = vld [vmem:[#allocation8 + $0x170] ss:$8 sps:$4 sm:$0xff]   ;;  %v3247_v8 = vld [vmem:[#allocation8 + $0x214] ss:$8 sps:$4 sm:$0xff]  }
 0x1ba   : > { %2372 = vmatpush1.bf16.msra.mxu0 %v3206_v9  ;;  %v1463_v26 = vmax.f32 %v1189_v17, 0.0  ;;  %v1193_v28 = vadd.f32 %v1192_v31, %v3859_v16  ;;  %v3223_v16 = vld [vmem:[#allocation8 + $0x194] ss:$8 sps:$4 sm:$0xff]   ;;  %v3245_v18 = vld [vmem:[#allocation8 + $0x210] ss:$8 sps:$4 sm:$0xff]  }
 0x1bb   : > { %2373 = vmatprep.subr.bf16.mxu0 %v3211_v13  ;;  %v1470_v29 = vmax.f32 %v1191_v27, 0.0  ;;  %v3250_v31 = vld [vmem:[#allocation8 + $0x224] ss:$8 sps:$4 sm:$0xff]  }
 0x1bc   : > { %v1471_v30 = vmax.f32 %v1193_v28, 0.0 }
 0x1bd   : > { %v1502_v32 = vpack.c.bf16 %v1470_v29, %v1462_v19 }
 0x1be   : > { %2374 = vmatpush1.bf16.msra.mxu0 %v3209_v25  ;;  %v1503_v34 = vpack.c.bf16 %v1471_v30, %v1463_v26 }
 0x1bf   : > { %2375 = vmatprep.subr.bf16.mxu0 %v3214_v41  ;;  %v3248_v41 = vld [vmem:[#allocation8 + $0x220] ss:$8 sps:$4 sm:$0xff]  }
 0x1c0   : > { %2352 = vmatprep.mubr.bf16.mxu0 %v1503_v34 }
 0x1c1   : > { %2353 = vmatmul.mubr.bf16.gmra.mrb[12].mxu0 %v1502_v32  ;;  %v3253_v32 = vld [vmem:[#allocation8 + $0x234] ss:$8 sps:$4 sm:$0xff]  }
 0x1c2   : > { %2376 = vmatpush1.bf16.msra.mxu0 %v3212_v33 }
 0x1c3   : > { %2377 = vmatprep.subr.bf16.mxu0 %v3217_v35 }
 0x1c6   : > { %2378 = vmatpush1.bf16.msra.mxu0 %v3215_v12 }
 0x1c7   : > { %2379 = vmatprep.subr.bf16.mxu0 %v3220_v36 }
 0x1ca   : > { %2380 = vmatpush1.bf16.msra.mxu0 %v3218_v45 }
 0x1cb   : > { %2381 = vmatprep.subr.bf16.mxu0 %v3223_v16 }
 0x1ce   : > { %2382 = vmatpush1.bf16.msra.mxu0 %v3221_v37  ;;  %v3251_v37 = vld [vmem:[#allocation8 + $0x230] ss:$8 sps:$4 sm:$0xff]  }
 0x1cf   : > { %2383 = vmatprep.subr.bf16.mxu0 %v3226_v38 }
 0x1d2   : > { %2384 = vmatpush1.bf16.msra.mxu0 %v3224_v39 }
 0x1d3   : > { %2385 = vmatprep.subr.bf16.mxu0 %v3229_v40  ;;  %v3256_v40 = vld [vmem:[#allocation8 + $0x244] ss:$8 sps:$4 sm:$0xff]  }
 0x1d6   : > { %2386 = vmatpush1.bf16.msra.mxu0 %v3227_v42 }
 0x1d7   : > { %2387 = vmatprep.subr.bf16.mxu0 %v3232_v43 }
 0x1da   : > { %2388 = vmatpush1.bf16.msra.mxu0 %v3230_v44 }
 0x1db   : > { %2389 = vmatprep.subr.bf16.mxu0 %v3235_v46  ;;  %v3254_v46 = vld [vmem:[#allocation8 + $0x240] ss:$8 sps:$4 sm:$0xff]  }
 0x1de   : > { %v1229_v52 = vpop.f32.mrb[16].mxu1  ;;  %2390 = vmatpush1.bf16.msra.mxu0 %v3233_v53  ;;  %v3259_v53 = vld [vmem:[#allocation8 + $0x254] ss:$8 sps:$4 sm:$0xff]  }
 0x1df   : > { %v1230_v55 = vadd.f32 %v1229_v52, %v3882_v49  ;;  %v1231_v56 = vpop.f32.mrb[17].mxu1  ;;  %2391 = vmatprep.subr.bf16.mxu0 %v3238_v50 }
 0x1e0   : > { %v1232_v58 = vadd.f32 %v1231_v56, %v3885_v51  ;;  %v1233_v59 = vpop.f32.mrb[18].mxu1 }
 0x1e1   : > { %v1416_v60 = vmax.f32 %v1230_v55, 0.0  ;;  %v1234_v61 = vadd.f32 %v1233_v59, %v3882_v49  ;;  %v1235_v62 = vpop.f32.mrb[19].mxu1  ;;  %v3257_v59 = vld [vmem:[#allocation8 + $0x250] ss:$8 sps:$4 sm:$0xff]  }
 0x1e2   : > { %v1236_v63 = vadd.f32 %v1235_v62, %v3885_v51  ;;  %2392 = vmatpush1.bf16.msra.mxu0 %v3236_v54  ;;  %v1417_v2 = vmax.f32 %v1232_v58, 0.0  ;;  %v3262_v62 = vld [vmem:[#allocation8 + $0x264] ss:$8 sps:$4 sm:$0xff]  }
 0x1e3   : > { %v1424_v0 = vmax.f32 %v1234_v61, 0.0  ;;  %2393 = vmatprep.subr.bf16.mxu0 %v3241_v57 }
 0x1e4   : > { %v1425_v3 = vmax.f32 %v1236_v63, 0.0 }
 0x1e5   : > { %v1480_v4 = vpack.c.bf16 %v1424_v0, %v1416_v60 }
 0x1e6   : > { %v1481_v5 = vpack.c.bf16 %v1425_v3, %v1417_v2  ;;  %2394 = vmatpush1.bf16.msra.mxu0 %v3239_v20  ;;  %v1239_v7 = vpop.f32.mrb[20].mxu1  ;;  %v3265_v3 = vld [vmem:[#allocation8 + $0x274] ss:$8 sps:$4 sm:$0xff]  }
 0x1e7   : > { %2436 = vmatprep.subr.bf16.mxu0 %v3244_v1  ;;  %v1240_v9 = vadd.f32 %v1239_v7, %v3882_v49  ;;  %v1241_v10 = vpop.f32.mrb[21].mxu1  ;;  %v3260_v1 = vld [vmem:[#allocation8 + $0x260] ss:$8 sps:$4 sm:$0xff]   ;;  %v3274_v7 = vld [vmem:[#allocation8 + $0x2a4] ss:$8 sps:$4 sm:$0xff]  }
 0x1e8   : > { %2395 = vmatprep.mubr.bf16.mxu0 %v1481_v5  ;;  %v1242_v11 = vadd.f32 %v1241_v10, %v3885_v51  ;;  %v1243_v13 = vpop.f32.mrb[22].mxu1  ;;  %v3266_v5 = vld [vmem:[#allocation8 + $0x280] ss:$8 sps:$4 sm:$0xff]   ;;  %v3275_v10 = vld [vmem:[#allocation8 + $0x2b0] ss:$8 sps:$4 sm:$0xff]  }
 0x1e9   : > { %2396 = vmatmul.mubr.bf16.vlgmr.msra.gmra.mrb[0].mxu0 %v1480_v4  ;;  %v1432_v14 = vmax.f32 %v1240_v9, 0.0  ;;  %v1244_v15 = vadd.f32 %v1243_v13, %v3882_v49  ;;  %v1245_v17 = vpop.f32.mrb[23].mxu1  ;;  %v3268_v4 = vld [vmem:[#allocation8 + $0x284] ss:$8 sps:$4 sm:$0xff]   ;;  %v3277_v9 = vld [vmem:[#allocation8 + $0x2b4] ss:$8 sps:$4 sm:$0xff]  }
 0x1ea   : > { %2437 = vmatpush1.bf16.msra.mxu0 %v3242_v6  ;;  %v1433_v19 = vmax.f32 %v1242_v11, 0.0  ;;  %v1246_v27 = vadd.f32 %v1245_v17, %v3885_v51  ;;  %v3269_v6 = vld [vmem:[#allocation8 + $0x290] ss:$8 sps:$4 sm:$0xff]   ;;  %v3280_v11 = vld [vmem:[#allocation8 + $0x2c4] ss:$8 sps:$4 sm:$0xff]   ;;  %v464_v17 = vsub.s32 5, %v3843_v21 }
 0x1eb   : > { %2438 = vmatprep.subr.bf16.mxu0 %v3247_v8  ;;  %v1440_v25 = vmax.f32 %v1244_v15, 0.0  ;;  %v3272_v8 = vld [vmem:[#allocation8 + $0x2a0] ss:$8 sps:$4 sm:$0xff]   ;;  %v460_v15 = vsub.s32 4, %v3843_v21 }
 0x1ec   : > { %v1441_v26 = vmax.f32 %v1246_v27, 0.0  ;;  %v3278_v13 = vld [vmem:[#allocation8 + $0x2c0] ss:$8 sps:$4 sm:$0xff]   ;;  %v3286_v27 = vld [vmem:[#allocation8 + $0x2e4] ss:$8 sps:$4 sm:$0xff]  }
 0x1ed   : > { %v1488_v28 = vpack.c.bf16 %v1440_v25, %v1432_v14  ;;  %v3283_v14 = vld [vmem:[#allocation8 + $0x2d4] ss:$8 sps:$4 sm:$0xff]  }
 0x1ee   : > { %2439 = vmatpush1.bf16.msra.mxu0 %v3245_v18  ;;  %v1489_v29 = vpack.c.bf16 %v1441_v26, %v1433_v19  ;;  %v1249_v30 = vpop.f32.mrb[24].mxu1  ;;  %v3281_v18 = vld [vmem:[#allocation8 + $0x2d0] ss:$8 sps:$4 sm:$0xff]   ;;  %v3906_v19 = vrot.slane %v3847_v23, %v460_v15  ;;  %v3284_v26 = vld [vmem:[#allocation8 + $0x2e0] ss:$8 sps:$4 sm:$0xff]  }
 0x1ef   : > { %2440 = vmatprep.subr.bf16.mxu0 %v3250_v31  ;;  %v1250_v33 = vadd.f32 %v1249_v30, %v3882_v49  ;;  %v1251_v34 = vpop.f32.mrb[25].mxu1  ;;  %v3909_v31 = vrot.slane %v3847_v23, %v464_v17 }
 0x1f0   : > { %v1252_v35 = vadd.f32 %v1251_v34, %v3885_v51  ;;  %v1253_v12 = vpop.f32.mrb[26].mxu1  ;;  %2405 = vmatprep.mubr.bf16.mxu0 %v1489_v29  ;;  %v3289_v29 = vld [vmem:[#allocation8 + $0x2f4] ss:$8 sps:$4 sm:$0xff]  }
 0x1f1   : > { %v1448_v36 = vmax.f32 %v1250_v33, 0.0  ;;  %v1254_v45 = vadd.f32 %v1253_v12, %v3882_v49  ;;  %v1255_v16 = vpop.f32.mrb[27].mxu1  ;;  %2406 = vmatmul.mubr.bf16.gmra.mrb[4].mxu0 %v1488_v28 }
 0x1f2   : > { %2441 = vmatpush1.bf16.msra.mxu0 %v3248_v41  ;;  %v1449_v38 = vmax.f32 %v1252_v35, 0.0  ;;  %v1256_v39 = vadd.f32 %v1255_v16, %v3885_v51  ;;  %v3292_v16 = vld [vmem:[#allocation8 + $0x304] ss:$8 sps:$4 sm:$0xff]  }
 0x1f3   : > { %2442 = vmatprep.subr.bf16.mxu0 %v3253_v32  ;;  %v1456_v42 = vmax.f32 %v1254_v45, 0.0 }
 0x1f4   : > { %v1457_v43 = vmax.f32 %v1256_v39, 0.0 }
 0x1f5   : > { %v1496_v44 = vpack.c.bf16 %v1456_v42, %v1448_v36  ;;  %v3287_v36 = vld [vmem:[#allocation8 + $0x2f0] ss:$8 sps:$4 sm:$0xff]   ;;  %v3290_v42 = vld [vmem:[#allocation8 + $0x300] ss:$8 sps:$4 sm:$0xff]  }
 0x1f6   : > { %2443 = vmatpush1.bf16.msra.mxu0 %v3251_v37  ;;  %v1497_v47 = vpack.c.bf16 %v1457_v43, %v1449_v38  ;;  %v1259_v48 = vpop.f32.mrb[28].mxu1 }
 0x1f7   : > { %2444 = vmatprep.subr.bf16.mxu0 %v3256_v40  ;;  %v1260_v50 = vadd.f32 %v1259_v48, %v3882_v49  ;;  %v1261_v52 = vpop.f32.mrb[29].mxu1 }
 0x1f8   : > { %v1262_v54 = vadd.f32 %v1261_v52, %v3885_v51  ;;  %v1263_v55 = vpop.f32.mrb[30].mxu1  ;;  %2415 = vmatprep.mubr.bf16.mxu0 %v1497_v47 }
 0x1f9   : > { %v1464_v56 = vmax.f32 %v1260_v50, 0.0  ;;  %v1264_v57 = vadd.f32 %v1263_v55, %v3882_v49  ;;  %v1265_v58 = vpop.f32.mrb[31].mxu1  ;;  %2416 = vmatmul.mubr.bf16.gmra.mrb[8].mxu0 %v1496_v44  ;;  %v3263_v49 = vld [vmem:[#allocation8 + $0x270] ss:$8 sps:$4 sm:$0xff]   ;;  %v3295_v44 = vld [vmem:[#allocation8 + $0x314] ss:$8 sps:$4 sm:$0xff]  }
 0x1fa   : > { %2445 = vmatpush1.bf16.msra.mxu0 %v3254_v46  ;;  %v1465_v60 = vmax.f32 %v1262_v54, 0.0  ;;  %v1266_v61 = vadd.f32 %v1265_v58, %v3885_v51  ;;  %v3271_v51 = vld [vmem:[#allocation8 + $0x294] ss:$8 sps:$4 sm:$0xff]   ;;  %v3293_v55 = vld [vmem:[#allocation8 + $0x310] ss:$8 sps:$4 sm:$0xff]  }
 0x1fb   : > { %2446 = vmatprep.subr.bf16.mxu0 %v3259_v53  ;;  %v1472_v63 = vmax.f32 %v1264_v57, 0.0  ;;  %v3298_v58 = vld [vmem:[#allocation8 + $0x324] ss:$8 sps:$4 sm:$0xff]  }
 0x1fc   : > { %v1473_v20 = vmax.f32 %v1266_v61, 0.0 }
 0x1fd   : > { %v1504_v0 = vpack.c.bf16 %v1472_v63, %v1464_v56 }
 0x1fe   : > { %2447 = vmatpush1.bf16.msra.mxu0 %v3257_v59  ;;  %v1505_v2 = vpack.c.bf16 %v1473_v20, %v1465_v60 }
 0x1ff   : > { %2448 = vmatprep.subr.bf16.mxu0 %v3262_v62  ;;  %v3296_v62 = vld [vmem:[#allocation8 + $0x320] ss:$8 sps:$4 sm:$0xff]  }
 0x200   : > { %2425 = vmatprep.mubr.bf16.mxu0 %v1505_v2 }
 0x201   : > { %2426 = vmatmul.mubr.bf16.gmra.mrb[12].mxu0 %v1504_v0  ;;  %v3301_v0 = vld [vmem:[#allocation8 + $0x334] ss:$8 sps:$4 sm:$0xff]  }
 0x202   : > { %2449 = vmatpush1.bf16.msra.mxu0 %v3260_v1 }
 0x203   : > { %2450 = vmatprep.subr.bf16.mxu0 %v3265_v3 }
 0x206   : > { %2451 = vmatpush1.bf16.msra.mxu0 %v3263_v49 }
 0x207   : > { %2452 = vmatprep.subr.bf16.mxu0 %v3268_v4 }
 0x20a   : > { %2453 = vmatpush1.bf16.msra.mxu0 %v3266_v5 }
 0x20b   : > { %2454 = vmatprep.subr.bf16.mxu0 %v3271_v51 }
 0x20e   : > { %2455 = vmatpush1.bf16.msra.mxu0 %v3269_v6  ;;  %v3299_v6 = vld [vmem:[#allocation8 + $0x330] ss:$8 sps:$4 sm:$0xff]  }
 0x20f   : > { %2456 = vmatprep.subr.bf16.mxu0 %v3274_v7 }
 0x212   : > { %2457 = vmatpush1.bf16.msra.mxu0 %v3272_v8 }
 0x213   : > { %2458 = vmatprep.subr.bf16.mxu0 %v3277_v9  ;;  %v3304_v9 = vld [vmem:[#allocation8 + $0x344] ss:$8 sps:$4 sm:$0xff]  }
 0x216   : > { %2459 = vmatpush1.bf16.msra.mxu0 %v3275_v10 }
 0x217   : > { %2460 = vmatprep.subr.bf16.mxu0 %v3280_v11 }
 0x21a   : > { %2461 = vmatpush1.bf16.msra.mxu0 %v3278_v13 }
 0x21b   : > { %2462 = vmatprep.subr.bf16.mxu0 %v3283_v14  ;;  %v3302_v14 = vld [vmem:[#allocation8 + $0x340] ss:$8 sps:$4 sm:$0xff]  }
 0x21e   : > { %v1302_v25 = vpop.f32.mrb[32].mxu1  ;;  %2463 = vmatpush1.bf16.msra.mxu0 %v3281_v18  ;;  %v3307_v18 = vld [vmem:[#allocation8 + $0x354] ss:$8 sps:$4 sm:$0xff]  }
 0x21f   : > { %v1303_v28 = vadd.f32 %v1302_v25, %v3906_v19  ;;  %v1304_v41 = vpop.f32.mrb[33].mxu1  ;;  %2464 = vmatprep.subr.bf16.mxu0 %v3286_v27 }
 0x220   : > { %v1305_v30 = vadd.f32 %v1304_v41, %v3909_v31  ;;  %v1306_v32 = vpop.f32.mrb[34].mxu1 }
 0x221   : > { %v1418_v33 = vmax.f32 %v1303_v28, 0.0  ;;  %v1307_v34 = vadd.f32 %v1306_v32, %v3906_v19  ;;  %v1308_v35 = vpop.f32.mrb[35].mxu1  ;;  %v3305_v32 = vld [vmem:[#allocation8 + $0x350] ss:$8 sps:$4 sm:$0xff]  }
 0x222   : > { %v1309_v12 = vadd.f32 %v1308_v35, %v3909_v31  ;;  %2465 = vmatpush1.bf16.msra.mxu0 %v3284_v26  ;;  %v1419_v37 = vmax.f32 %v1305_v30, 0.0  ;;  %v3310_v35 = vld [vmem:[#allocation8 + $0x364] ss:$8 sps:$4 sm:$0xff]  }
 0x223   : > { %v1426_v45 = vmax.f32 %v1307_v34, 0.0  ;;  %2466 = vmatprep.subr.bf16.mxu0 %v3289_v29 }
 0x224   : > { %v1427_v38 = vmax.f32 %v1309_v12, 0.0 }
 0x225   : > { %v1482_v39 = vpack.c.bf16 %v1426_v45, %v1418_v33 }
 0x226   : > { %v1483_v40 = vpack.c.bf16 %v1427_v38, %v1419_v37  ;;  %2467 = vmatpush1.bf16.msra.mxu0 %v3287_v36  ;;  %v1312_v43 = vpop.f32.mrb[36].mxu1  ;;  %v3313_v38 = vld [vmem:[#allocation8 + $0x374] ss:$8 sps:$4 sm:$0xff]  }
 0x227   : > { %2509 = vmatprep.subr.bf16.mxu0 %v3292_v16  ;;  %v1313_v46 = vadd.f32 %v1312_v43, %v3906_v19  ;;  %v1314_v47 = vpop.f32.mrb[37].mxu1  ;;  %v3308_v16 = vld [vmem:[#allocation8 + $0x360] ss:$8 sps:$4 sm:$0xff]   ;;  %v3322_v43 = vld [vmem:[#allocation8 + $0x3a4] ss:$8 sps:$4 sm:$0xff]  }
 0x228   : > { %2468 = vmatprep.mubr.bf16.mxu0 %v1483_v40  ;;  %v1315_v48 = vadd.f32 %v1314_v47, %v3909_v31  ;;  %v1316_v53 = vpop.f32.mrb[38].mxu1  ;;  %v3314_v40 = vld [vmem:[#allocation8 + $0x380] ss:$8 sps:$4 sm:$0xff]   ;;  %v3323_v47 = vld [vmem:[#allocation8 + $0x3b0] ss:$8 sps:$4 sm:$0xff]  }
 0x229   : > { %2469 = vmatmul.mubr.bf16.vlgmr.msra.gmra.mrb[0].mxu0 %v1482_v39  ;;  %v1434_v50 = vmax.f32 %v1313_v46, 0.0  ;;  %v1317_v52 = vadd.f32 %v1316_v53, %v3906_v19  ;;  %v1318_v54 = vpop.f32.mrb[39].mxu1  ;;  %v3316_v39 = vld [vmem:[#allocation8 + $0x384] ss:$8 sps:$4 sm:$0xff]   ;;  %v3325_v46 = vld [vmem:[#allocation8 + $0x3b4] ss:$8 sps:$4 sm:$0xff]  }
 0x22a   : > { %2510 = vmatpush1.bf16.msra.mxu0 %v3290_v42  ;;  %v1435_v56 = vmax.f32 %v1315_v48, 0.0  ;;  %v1319_v57 = vadd.f32 %v1318_v54, %v3909_v31  ;;  %v3317_v42 = vld [vmem:[#allocation8 + $0x390] ss:$8 sps:$4 sm:$0xff]   ;;  %v3328_v48 = vld [vmem:[#allocation8 + $0x3c4] ss:$8 sps:$4 sm:$0xff]   ;;  %v472_v54 = vsub.s32 7, %v3843_v21 }
 0x22b   : > { %2511 = vmatprep.subr.bf16.mxu0 %v3295_v44  ;;  %v1442_v59 = vmax.f32 %v1317_v52, 0.0  ;;  %v3320_v44 = vld [vmem:[#allocation8 + $0x3a0] ss:$8 sps:$4 sm:$0xff]   ;;  %v468_v52 = vsub.s32 6, %v3843_v21 }
 0x22c   : > { %v1443_v60 = vmax.f32 %v1319_v57, 0.0  ;;  %v3326_v53 = vld [vmem:[#allocation8 + $0x3c0] ss:$8 sps:$4 sm:$0xff]   ;;  %v3334_v57 = vld [vmem:[#allocation8 + $0x3e4] ss:$8 sps:$4 sm:$0xff]  }
 0x22d   : > { %v1490_v61 = vpack.c.bf16 %v1442_v59, %v1434_v50  ;;  %v3331_v50 = vld [vmem:[#allocation8 + $0x3d4] ss:$8 sps:$4 sm:$0xff]  }
 0x22e   : > { %2512 = vmatpush1.bf16.msra.mxu0 %v3293_v55  ;;  %v1491_v63 = vpack.c.bf16 %v1443_v60, %v1435_v56  ;;  %v1322_v20 = vpop.f32.mrb[40].mxu1  ;;  %v3329_v55 = vld [vmem:[#allocation8 + $0x3d0] ss:$8 sps:$4 sm:$0xff]   ;;  %v3930_v56 = vrot.slane %v3847_v23, %v468_v52  ;;  %v3332_v60 = vld [vmem:[#allocation8 + $0x3e0] ss:$8 sps:$4 sm:$0xff]  }
 0x22f   : > { %2513 = vmatprep.subr.bf16.mxu0 %v3298_v58  ;;  %v1323_v1 = vadd.f32 %v1322_v20, %v3906_v19  ;;  %v1324_v2 = vpop.f32.mrb[41].mxu1  ;;  %v3933_v58 = vrot.slane %v3847_v23, %v472_v54 }
 0x230   : > { %v1325_v3 = vadd.f32 %v1324_v2, %v3909_v31  ;;  %v1326_v49 = vpop.f32.mrb[42].mxu1  ;;  %2478 = vmatprep.mubr.bf16.mxu0 %v1491_v63  ;;  %v3337_v63 = vld [vmem:[#allocation8 + $0x3f4] ss:$8 sps:$4 sm:$0xff]  }
 0x231   : > { %v1450_v4 = vmax.f32 %v1323_v1, 0.0  ;;  %v1327_v5 = vadd.f32 %v1326_v49, %v3906_v19  ;;  %v1328_v51 = vpop.f32.mrb[43].mxu1  ;;  %2479 = vmatmul.mubr.bf16.gmra.mrb[4].mxu0 %v1490_v61  ;;  %v3335_v49 = vld [vmem:[#allocation8 + $0x3f0] ss:$8 sps:$4 sm:$0xff]  }
 0x232   : > { %2514 = vmatpush1.bf16.msra.mxu0 %v3296_v62  ;;  %v1451_v7 = vmax.f32 %v1325_v3, 0.0  ;;  %v1329_v8 = vadd.f32 %v1328_v51, %v3909_v31 }
 0x233   : > { %2515 = vmatprep.subr.bf16.mxu0 %v3301_v0  ;;  %v1458_v10 = vmax.f32 %v1327_v5, 0.0 }
 0x234   : > { %v1459_v11 = vmax.f32 %v1329_v8, 0.0 }
 0x235   : > { %v1498_v13 = vpack.c.bf16 %v1458_v10, %v1450_v4 }
 0x236   : > { %2516 = vmatpush1.bf16.msra.mxu0 %v3299_v6  ;;  %v1499_v15 = vpack.c.bf16 %v1459_v11, %v1451_v7  ;;  %v1332_v17 = vpop.f32.mrb[44].mxu1 }
 0x237   : > { %2517 = vmatprep.subr.bf16.mxu0 %v3304_v9  ;;  %v1333_v27 = vadd.f32 %v1332_v17, %v3906_v19  ;;  %v1334_v25 = vpop.f32.mrb[45].mxu1 }
 0x238   : > { %v1335_v26 = vadd.f32 %v1334_v25, %v3909_v31  ;;  %v1336_v28 = vpop.f32.mrb[46].mxu1  ;;  %2488 = vmatprep.mubr.bf16.mxu0 %v1499_v15 }
 0x239   : > { %v1466_v41 = vmax.f32 %v1333_v27, 0.0  ;;  %v1337_v29 = vadd.f32 %v1336_v28, %v3906_v19  ;;  %v1338_v30 = vpop.f32.mrb[47].mxu1  ;;  %2489 = vmatmul.mubr.bf16.gmra.mrb[8].mxu0 %v1498_v13  ;;  %v3311_v19 = vld [vmem:[#allocation8 + $0x370] ss:$8 sps:$4 sm:$0xff]  }
 0x23a   : > { %2518 = vmatpush1.bf16.msra.mxu0 %v3302_v14  ;;  %v1467_v33 = vmax.f32 %v1335_v26, 0.0  ;;  %v1339_v34 = vadd.f32 %v1338_v30, %v3909_v31  ;;  %v3319_v31 = vld [vmem:[#allocation8 + $0x394] ss:$8 sps:$4 sm:$0xff]  }
 0x23b   : > { %2519 = vmatprep.subr.bf16.mxu0 %v3307_v18  ;;  %v1474_v12 = vmax.f32 %v1337_v29, 0.0 }
 0x23c   : > { %v1475_v36 = vmax.f32 %v1339_v34, 0.0 }
 0x23d   : > { %v1506_v45 = vpack.c.bf16 %v1474_v12, %v1466_v41 }
 0x23e   : > { %2520 = vmatpush1.bf16.msra.mxu0 %v3305_v32  ;;  %v1507_v37 = vpack.c.bf16 %v1475_v36, %v1467_v33 }
 0x23f   : > { %2521 = vmatprep.subr.bf16.mxu0 %v3310_v35 }
 0x240   : > { %2498 = vmatprep.mubr.bf16.mxu0 %v1507_v37 }
 0x241   : > { %2499 = vmatmul.mubr.bf16.gmra.mrb[12].mxu0 %v1506_v45 }
 0x242   : > { %2522 = vmatpush1.bf16.msra.mxu0 %v3308_v16 }
 0x243   : > { %2523 = vmatprep.subr.bf16.mxu0 %v3313_v38 }
 0x246   : > { %2524 = vmatpush1.bf16.msra.mxu0 %v3311_v19 }
 0x247   : > { %2525 = vmatprep.subr.bf16.mxu0 %v3316_v39 }
 0x24a   : > { %2526 = vmatpush1.bf16.msra.mxu0 %v3314_v40 }
 0x24b   : > { %2527 = vmatprep.subr.bf16.mxu0 %v3319_v31 }
 0x24e   : > { %2528 = vmatpush1.bf16.msra.mxu0 %v3317_v42 }
 0x24f   : > { %2529 = vmatprep.subr.bf16.mxu0 %v3322_v43 }
 0x252   : > { %2530 = vmatpush1.bf16.msra.mxu0 %v3320_v44 }
 0x253   : > { %2531 = vmatprep.subr.bf16.mxu0 %v3325_v46 }
 0x256   : > { %2532 = vmatpush1.bf16.msra.mxu0 %v3323_v47 }
 0x257   : > { %2533 = vmatprep.subr.bf16.mxu0 %v3328_v48 }
 0x25a   : > { %2534 = vmatpush1.bf16.msra.mxu0 %v3326_v53 }
 0x25b   : > { %2535 = vmatprep.subr.bf16.mxu0 %v3331_v50 }
 0x25e   : > { %v1375_v59 = vpop.f32.mrb[48].mxu1  ;;  %2536 = vmatpush1.bf16.msra.mxu0 %v3329_v55 }
 0x25f   : > { %v1376_v61 = vadd.f32 %v1375_v59, %v3930_v56  ;;  %v1377_v62 = vpop.f32.mrb[49].mxu1  ;;  %2537 = vmatprep.subr.bf16.mxu0 %v3334_v57  ;;  %v1638_v59 = vld [vmem:[%s4032_s4] sm:$0x3] }
 0x260   : > { %v1378_v20 = vadd.f32 %v1377_v62, %v3933_v58  ;;  %v1379_v0 = vpop.f32.mrb[50].mxu1 }
 0x261   : > { %v1380_v1 = vadd.f32 %v1379_v0, %v3930_v56  ;;  %v1381_v2 = vpop.f32.mrb[51].mxu1  ;;  %v1420_v23 = vmax.f32 %v1376_v61, 0.0 }
 0x262   : > { %v1382_v3 = vadd.f32 %v1381_v2, %v3933_v58  ;;  %2538 = vmatpush1.bf16.msra.mxu0 %v3332_v60  ;;  %v1421_v5 = vmax.f32 %v1378_v20, 0.0  ;;  %v1647_v60 = vrot.slane %v1638_v59, %v448_v24 }
 0x263   : > { %v1428_v4 = vmax.f32 %v1380_v1, 0.0  ;;  %2539 = vmatprep.subr.bf16.mxu0 %v3337_v63 }
 0x264   : > { %v1429_v51 = vmax.f32 %v1382_v3, 0.0 }
 0x265   : > { %v1484_v6 = vpack.c.bf16 %v1428_v4, %v1420_v23 }
 0x266   : > { %v1485_v7 = vpack.c.bf16 %v1429_v51, %v1421_v5  ;;  %v1385_v8 = vpop.f32.mrb[52].mxu1  ;;  %2540 = vmatpush1.bf16.msra.mxu0 %v3335_v49 }
 0x267   : > { %v1386_v9 = vadd.f32 %v1385_v8, %v3930_v56  ;;  %v1387_v10 = vpop.f32.mrb[53].mxu1 }
 0x268   : > { %v1388_v11 = vadd.f32 %v1387_v10, %v3933_v58  ;;  %v1389_v13 = vpop.f32.mrb[54].mxu1  ;;  %2541 = vmatprep.mubr.bf16.mxu0 %v1485_v7 }
 0x269   : > { %v1390_v14 = vadd.f32 %v1389_v13, %v3930_v56  ;;  %v1391_v15 = vpop.f32.mrb[55].mxu1  ;;  %2542 = vmatmul.mubr.bf16.vlgmr.msra.gmra.mrb[0].mxu0 %v1484_v6  ;;  %v1436_v18 = vmax.f32 %v1386_v9, 0.0 }
 0x26a   : > { %v1392_v17 = vadd.f32 %v1391_v15, %v3933_v58  ;;  %v1437_v25 = vmax.f32 %v1388_v11, 0.0 }
 0x26b   : > { %v1444_v27 = vmax.f32 %v1390_v14, 0.0 }
 0x26c   : > { %v1445_v26 = vmax.f32 %v1392_v17, 0.0 }
 0x26d   : > { %v1492_v28 = vpack.c.bf16 %v1444_v27, %v1436_v18 }
 0x26e   : > { %v1493_v41 = vpack.c.bf16 %v1445_v26, %v1437_v25  ;;  %v1395_v29 = vpop.f32.mrb[56].mxu1 }
 0x26f   : > { %v1396_v30 = vadd.f32 %v1395_v29, %v3930_v56  ;;  %v1397_v32 = vpop.f32.mrb[57].mxu1 }
 0x270   : > { %v1398_v33 = vadd.f32 %v1397_v32, %v3933_v58  ;;  %v1399_v34 = vpop.f32.mrb[58].mxu1  ;;  %2551 = vmatprep.mubr.bf16.mxu0 %v1493_v41 }
 0x271   : > { %v1400_v35 = vadd.f32 %v1399_v34, %v3930_v56  ;;  %v1401_v12 = vpop.f32.mrb[59].mxu1  ;;  %2552 = vmatmul.mubr.bf16.gmra.mrb[4].mxu0 %v1492_v28  ;;  %v1452_v45 = vmax.f32 %v1396_v30, 0.0 }
 0x272   : > { %v1402_v36 = vadd.f32 %v1401_v12, %v3933_v58  ;;  %v1453_v37 = vmax.f32 %v1398_v33, 0.0 }
 0x273   : > { %v1460_v16 = vmax.f32 %v1400_v35, 0.0 }
 0x274   : > { %v1461_v38 = vmax.f32 %v1402_v36, 0.0 }
 0x275   : > { %v1500_v19 = vpack.c.bf16 %v1460_v16, %v1452_v45 }
 0x276   : > { %v1501_v39 = vpack.c.bf16 %v1461_v38, %v1453_v37  ;;  %v1405_v40 = vpop.f32.mrb[60].mxu1 }
 0x277   : > { %v1406_v31 = vadd.f32 %v1405_v40, %v3930_v56  ;;  %v1407_v42 = vpop.f32.mrb[61].mxu1 }
 0x278   : > { %v1408_v43 = vadd.f32 %v1407_v42, %v3933_v58  ;;  %v1409_v44 = vpop.f32.mrb[62].mxu1  ;;  %2561 = vmatprep.mubr.bf16.mxu0 %v1501_v39 }
 0x279   : > { %v1410_v46 = vadd.f32 %v1409_v44, %v3930_v56  ;;  %v1411_v47 = vpop.f32.mrb[63].mxu1  ;;  %2562 = vmatmul.mubr.bf16.gmra.mrb[8].mxu0 %v1500_v19  ;;  %v1468_v53 = vmax.f32 %v1406_v31, 0.0  ;;  %v1643_v56 = vrot.slane %v1638_v59, %v444_v22 }
 0x27a   : > { %v1412_v48 = vadd.f32 %v1411_v47, %v3933_v58  ;;  %v1469_v52 = vmax.f32 %v1408_v43, 0.0 }
 0x27b   : > { %v1476_v50 = vmax.f32 %v1410_v46, 0.0 }
 0x27c   : > { %v1477_v54 = vmax.f32 %v1412_v48, 0.0 }
 0x27d   : > { %v1508_v55 = vpack.c.bf16 %v1476_v50, %v1468_v53 }
 0x27e   : > { %v1509_v57 = vpack.c.bf16 %v1477_v54, %v1469_v52 }
 0x280   : > { %2571 = vmatprep.mubr.bf16.mxu0 %v1509_v57 }
 0x281   : > { %2572 = vmatmul.mubr.bf16.gmra.mrb[12].mxu0 %v1508_v55 }
 0x33c   : > { %v2543_v58 = vpop.f32.mrb[0].mxu0 }
 0x33d   : > { %v2997_v61 = vadd.f32 %v2543_v58, %v1643_v56  ;;  %v2545_v62 = vpop.f32.mrb[1].mxu0 }
 0x33e   : > { %v2998_v63 = vadd.f32 %v2545_v62, %v1647_v60  ;;  %v2547_v20 = vpop.f32.mrb[2].mxu0 }
 0x33f   : > { %2582 = vst [vmem:[%s3960_s11] sm:$0xff] %v2997_v61  ;;  %v2999_v0 = vadd.f32 %v2547_v20, %v1643_v56  ;;  %v2549_v22 = vpop.f32.mrb[3].mxu0 }
 0x340   : > { %2583 = vst [vmem:[%s3960_s11 + $0x8] sm:$0xff] %v2998_v63  ;;  %v3000_v21 = vadd.f32 %v2549_v22, %v1647_v60 }
 0x341   : > { %2584 = vst [vmem:[%s3960_s11 + $0x10] sm:$0xff] %v2999_v0 }
 0x342   : > { %2585 = vst [vmem:[%s3960_s11 + $0x18] sm:$0xff] %v3000_v21 }
 0x344   : > { %v2553_v24 = vpop.f32.mrb[4].mxu0 }
 0x345   : > { %v3001_v1 = vadd.f32 %v2553_v24, %v1643_v56  ;;  %v2555_v2 = vpop.f32.mrb[5].mxu0 }
 0x346   : > { %v3002_v3 = vadd.f32 %v2555_v2, %v1647_v60  ;;  %v2557_v49 = vpop.f32.mrb[6].mxu0 }
 0x347   : > { %2586 = vst [vmem:[%s3960_s11 + $0x20] sm:$0xff] %v3001_v1  ;;  %v3003_v23 = vadd.f32 %v2557_v49, %v1643_v56  ;;  %v2559_v4 = vpop.f32.mrb[7].mxu0 }
 0x348   : > { %2587 = vst [vmem:[%s3960_s11 + $0x28] sm:$0xff] %v3002_v3  ;;  %v3004_v5 = vadd.f32 %v2559_v4, %v1647_v60 }
 0x349   : > { %2588 = vst [vmem:[%s3960_s11 + $0x30] sm:$0xff] %v3003_v23 }
 0x34a   : > { %2589 = vst [vmem:[%s3960_s11 + $0x38] sm:$0xff] %v3004_v5 }
 0x34c   : > { %v2563_v51 = vpop.f32.mrb[8].mxu0 }
 0x34d   : > { %v3005_v6 = vadd.f32 %v2563_v51, %v1643_v56  ;;  %v2565_v7 = vpop.f32.mrb[9].mxu0 }
 0x34e   : > { %v3006_v8 = vadd.f32 %v2565_v7, %v1647_v60  ;;  %v2567_v9 = vpop.f32.mrb[10].mxu0 }
 0x34f   : > { %2590 = vst [vmem:[%s3960_s11 + $0x40] sm:$0xff] %v3005_v6  ;;  %v3007_v10 = vadd.f32 %v2567_v9, %v1643_v56  ;;  %v2569_v11 = vpop.f32.mrb[11].mxu0 }
 0x350   : > { %2591 = vst [vmem:[%s3960_s11 + $0x48] sm:$0xff] %v3006_v8  ;;  %v3008_v13 = vadd.f32 %v2569_v11, %v1647_v60 }
 0x351   : > { %2592 = vst [vmem:[%s3960_s11 + $0x50] sm:$0xff] %v3007_v10 }
 0x352   : > { %2593 = vst [vmem:[%s3960_s11 + $0x58] sm:$0xff] %v3008_v13 }
 0x354   : > { %v2573_v14 = vpop.f32.mrb[12].mxu0 }
 0x355   : > { %v3009_v15 = vadd.f32 %v2573_v14, %v1643_v56  ;;  %v2575_v17 = vpop.f32.mrb[13].mxu0 }
 0x356   : > { %v3010_v18 = vadd.f32 %v2575_v17, %v1647_v60  ;;  %v2577_v27 = vpop.f32.mrb[14].mxu0 }
 0x357   : > { %2594 = vst [vmem:[%s3960_s11 + $0x60] sm:$0xff] %v3009_v15  ;;  %v3011_v25 = vadd.f32 %v2577_v27, %v1643_v56  ;;  %v2579_v26 = vpop.f32.mrb[15].mxu0 }
 0x358   : > { %2595 = vst [vmem:[%s3960_s11 + $0x68] sm:$0xff] %v3010_v18  ;;  %v3012_v28 = vadd.f32 %v2579_v26, %v1647_v60 }
 0x359   : > { %2596 = vst [vmem:[%s3960_s11 + $0x70] sm:$0xff] %v3011_v25 }
 0x35a   : > { %2597 = vst [vmem:[%s3960_s11 + $0x78] sm:$0xff] %v3012_v28 }
 0x35b   : > { %3465 = shalt.err (!%p3462_p4)
}
 0x35c   : > { %s3466_s23 = scalar_lea.hbm %s3980_s9, 2048  ;;  %s3470_s24 = scalar_lea.hbm %s4033_s5, 8192 }
 0x35d   : > { %p3467_p9 = scmp.ne.s32.totalorder %s3980_s9, %s3466_s23  ;;  %p3471_p8 = scmp.lt.u32.totalorder %s3980_s9, %s4033_s5 }
 0x35e   : > { %p3472_p12 = scmp.lt.u32.totalorder %s3470_s24, %s3466_s23  ;;  %p3474_p0 = scmp.lt.u32.totalorder %s3466_s23, %s3980_s9 }
 0x35f   : > { %p3468_p13 = pnand %p3467_p9, %p3715_p5 }
 0x360   : > { %p3473_p6 = por %p3472_p12, %p3471_p8 }
 0x361   : > { %p3469_p10 = pneg %p3468_p13 }
 0x362   : > { %p3475_p3 = por %p3474_p0, %p3473_p6 }
 0x364   : > { %p3476_p7 = pnand %p3475_p3, %p3469_p10 }
 0x366   : > { %3479 = shalt.err (!%p3476_p7)
}
 0x367   : > { %s3539_s13 = smov 256   ;;  %s3540_s14 = smov 16  }
 0x368   : > { %3075 = dma.vmem_to_hbm [thread:$0]  (%p3715_p5), %s3982_s6, 2048, %s3980_s9, %s2599_s22, %s3539_s13, %s3539_s13, %s3540_s14  }
 0x369 PF: > { %p3102_p11 = scmp.ge.s32.totalorder %s3526_s21, 2  ;;  %s2628_s29 = sand.u32 1, %s3514_s18  }
 0x36a   : > { %p4051_p2 = scmp.ne.s32.totalorder %s4038_s25, 0  ;;  %s2629_s10 = scalar_lea.sflag [#allocation4], %s2628_s29 }
 0x36c   : > { %p3092_p1 = pnand %p3102_p11, %p4051_p2 }
 0x36e   : > { %3509 = dma.done.wait (!%p3092_p1), %s2629_s10, 2048  }
 0x36f   : > { %3511 = vsyncadd (!%p3092_p1), %s2629_s10, 4294965248  ;;  %p20_p4 = scmp.ge.s32.totalorder %s3701_s28, 6   ;;  %s4052_s18 = smov %s3518_s19 }
 0x370   : > { %s4053_s19 = smov %s3522_s20  ;;  %s4054_s20 = smov %s3711_s27 }
 0x371   : > { %s4055_s21 = smov %s3701_s28  ;;  %22 = sbr.rel (!%p20_p4) target bundleno = 7 (0x7), region = 97 }
 0x378   :  { %2634 = vsyncpa [#allocation3], 1 }
 0x379   :  { %2636 = vsyncpa [#allocation3 + $0x1], 1 }
 0x37a   :  { %2637 = vsyncpa [#allocation6], 1 }
 0x37b   :  { %2638 = vsyncpa [#allocation9], 1 }
 0x37c   :  { %2639 = vsyncpa [#allocation4], 1 }
 0x37d   :  { %2641 = vsyncpa [#allocation4 + $0x1], 1 }

</bundles_post_ra>
